<compile_context>
chip_gen: v6e
topology: v6e:2x2x1
jax: 0.10.0
libtpu: 0.0.40
codegen_flags: <defaults>
</compile_context>

<pallas_src>
import numpy as np
import jax
import jax.numpy as jnp
from jax.experimental import pallas as pl
from jax.experimental.pallas import tpu as pltpu

B = 2
C_IN, C_OUT = 32, 64
H_IN, W_IN = 16, 16
KH, KW = 3, 3
STRIDE, PAD = 2, 1
H_OUT = (H_IN + 2 * PAD - KH) // STRIDE + 1   # 8
W_OUT = (W_IN + 2 * PAD - KW) // STRIDE + 1   # 8
H_PAD = H_IN + 2 * PAD                        # 18
W_PAD = W_IN + 2 * PAD                        # 18
W_HALF = W_PAD // STRIDE                      # 9


def bu1_kernel(x_ref, w_ref, b_ref, o_ref):
    # x_ref: (B, H_PAD, 2, W_HALF, C_IN) f32   (dim 2 is W parity: w = 2*wq + wr)
    # w_ref: (KH*KW, C_IN, C_OUT) bf16
    # b_ref: (1, C_OUT) f32
    # o_ref: (B*H_OUT*W_OUT, C_OUT) f32
    batch = x_ref.shape[0]
    m = batch * H_OUT * W_OUT

    acc = jnp.zeros((m, C_OUT), jnp.float32)
    for ky in range(KH):
        for kx in range(KW):
            wr, wq0 = kx % STRIDE, kx // STRIDE
            # Rows ky..ky+15, W parity wr, W quotients wq0..wq0+7 -> (B, 16, 8, C_IN).
            blk = x_ref[:, ky:ky + STRIDE * H_OUT, wr, wq0:wq0 + W_OUT, :]
            # Keep every 2nd row (rows ky, ky+2, ...): split the (major) H dim, phase 0.
            blk = blk.reshape(batch, H_OUT, STRIDE, W_OUT, C_IN)[:, :, 0]
            # (B, H_OUT, W_OUT, C_IN) -> (M, C_IN); cast to bf16 for a single-pass MXU issue.
            tap = blk.reshape(m, C_IN).astype(jnp.bfloat16)
            acc = acc + jnp.dot(tap, w_ref[ky * KW + kx],
                                preferred_element_type=jnp.float32)

    z = acc + b_ref[...]
    # SiLU: sigmoid via EUP exp + approximate EUP reciprocal (separate VLIW slots).
    o_ref[...] = z * pl.reciprocal(1.0 + jnp.exp(-z), approx=True)


def bu1_forward(x, w, b):
    """x: (B, C_IN, H, W) NCHW f32. w: (C_OUT, C_IN, KH, KW) PyTorch layout. b: (C_OUT,)."""
    batch = x.shape[0]
    m = batch * H_OUT * W_OUT

    # Cheap layout glue (fuses into ~1 XLA op): NCHW->NHWC, spatial pad, split W into
    # (parity, half-width) so the in-kernel stride-2 selection is a static index plus
    # a unit-stride slice (no strided slices / relayouts inside the kernel).
    x_nhwc = jnp.transpose(x, (0, 2, 3, 1))
    x_pad = jnp.pad(x_nhwc, ((0, 0), (PAD, PAD), (PAD, PAD), (0, 0)))
    x_r = x_pad.reshape(batch, H_PAD, W_HALF, STRIDE, C_IN).transpose(0, 1, 3, 2, 4)

    # Compact weights: (tap, c_in, c_out), bf16.  Bias stays f32.
    w_k = jnp.transpose(w, (2, 3, 1, 0)).reshape(KH * KW, C_IN, C_OUT).astype(jnp.bfloat16)
    b_2d = b.reshape(1, C_OUT).astype(jnp.float32)

    cost = pl.CostEstimate(
        flops=2 * m * KH * KW * C_IN * C_OUT,
        transcendentals=m * C_OUT,
        bytes_accessed=x_r.size * 4 + w_k.size * 2 + b_2d.size * 4 + m * C_OUT * 4)

    out_mat = pl.pallas_call(
        bu1_kernel,
        out_shape=jax.ShapeDtypeStruct((m, C_OUT), jnp.float32),
        in_specs=[pl.BlockSpec(memory_space=pltpu.MemorySpace.VMEM)] * 3,
        out_specs=pl.BlockSpec(memory_space=pltpu.MemorySpace.VMEM),
        cost_estimate=cost,
    )(x_r, w_k, b_2d)

    out = out_mat.reshape(batch, H_OUT, W_OUT, C_OUT)
    return jnp.transpose(out, (0, 3, 1, 2))                       # (B, C_out, H_out, W_out)


def reference_forward(x, w, b):
    """Pure-JAX reference matching the PyTorch module exactly."""
    out = jax.lax.conv_general_dilated(
        x, w,
        window_strides=(STRIDE, STRIDE),
        padding=((PAD, PAD), (PAD, PAD)),
        dimension_numbers=("NCHW", "OIHW", "NCHW"),
        precision=jax.lax.Precision.HIGHEST)
    out = out + b.reshape(1, -1, 1, 1)
    return out * jax.nn.sigmoid(out)


if __name__ == "__main__":
    key = jax.random.PRNGKey(0)
    ks = jax.random.split(key, 3)

    x = jax.random.normal(ks[0], (B, C_IN, H_IN, W_IN), jnp.float32)
    w = jax.random.normal(ks[1], (C_OUT, C_IN, KH, KW), jnp.float32) * (1.0 / np.sqrt(C_IN * KH * KW))
    b = jax.random.normal(ks[2], (C_OUT,), jnp.float32) * 0.1

    out = jax.jit(bu1_forward)(x, w, b)
    out = jax.block_until_ready(out)
    assert out.shape == (B, C_OUT, H_OUT, W_OUT)

    ref = reference_forward(x, w, b)
    np.testing.assert_allclose(np.asarray(out), np.asarray(ref), rtol=2e-2, atol=2e-2)

    print("KERNEL_OK")
</pallas_src>

<mosaic_0001>
module attributes {stable_mosaic.version = 11 : i64} {
  func.func @bu1_kernel(%arg0: memref<2x18x2x9x32xf32, #tpu.memory_space<vmem>>, %arg1: memref<9x32x64xbf16, #tpu.memory_space<vmem>>, %arg2: memref<1x64xf32, #tpu.memory_space<vmem>>, %arg3: memref<128x64xf32, #tpu.memory_space<vmem>>) attributes {dimension_semantics = [], scalar_prefetch = 0 : i64, scratch_operands = 0 : i64, tpu.core_type = #tpu.core_type<tc>} {
    %cst = arith.constant 0.000000e+00 : f32
    %0 = vector.broadcast %cst : f32 to vector<128x64xf32>
    %c0 = arith.constant 0 : index
    %c0_0 = arith.constant 0 : index
    %c0_1 = arith.constant 0 : index
    %c0_2 = arith.constant 0 : index
    %c0_3 = arith.constant 0 : index
    %1 = vector.load %arg0[%c0, %c0_0, %c0_1, %c0_2, %c0_3] : memref<2x18x2x9x32xf32, #tpu.memory_space<vmem>>, vector<2x16x1x8x32xf32>
    %2 = vector.shape_cast %1 : vector<2x16x1x8x32xf32> to vector<2x16x8x32xf32>
    %3 = vector.shape_cast %2 : vector<2x16x8x32xf32> to vector<2x8x2x8x32xf32>
    %4 = vector.extract_strided_slice %3 {offsets = [0, 0, 0, 0, 0], sizes = [2, 8, 1, 8, 32], strides = [1, 1, 1, 1, 1]} : vector<2x8x2x8x32xf32> to vector<2x8x1x8x32xf32>
    %5 = vector.shape_cast %4 : vector<2x8x1x8x32xf32> to vector<2x8x8x32xf32>
    %6 = vector.shape_cast %5 : vector<2x8x8x32xf32> to vector<128x32xf32>
    %7 = arith.truncf %6 : vector<128x32xf32> to vector<128x32xbf16>
    %c0_4 = arith.constant 0 : index
    %c0_5 = arith.constant 0 : index
    %c0_6 = arith.constant 0 : index
    %8 = vector.load %arg1[%c0_4, %c0_5, %c0_6] : memref<9x32x64xbf16, #tpu.memory_space<vmem>>, vector<1x32x64xbf16>
    %9 = vector.shape_cast %8 : vector<1x32x64xbf16> to vector<32x64xbf16>
    %cst_7 = arith.constant dense<0.000000e+00> : vector<128x64xf32>
    %10 = tpu.matmul %7, %9, %cst_7 {dimension_numbers = #tpu.dot_dimension_numbers<[1], [0], [0], [1], [0, 0, 1, 1], [], []>} : vector<128x32xbf16>, vector<32x64xbf16>, vector<128x64xf32> -> vector<128x64xf32>
    %11 = arith.addf %0, %10 : vector<128x64xf32>
    %c0_8 = arith.constant 0 : index
    %c0_9 = arith.constant 0 : index
    %c1 = arith.constant 1 : index
    %c0_10 = arith.constant 0 : index
    %c0_11 = arith.constant 0 : index
    %12 = vector.load %arg0[%c0_8, %c0_9, %c1, %c0_10, %c0_11] : memref<2x18x2x9x32xf32, #tpu.memory_space<vmem>>, vector<2x16x1x8x32xf32>
    %13 = vector.shape_cast %12 : vector<2x16x1x8x32xf32> to vector<2x16x8x32xf32>
    %14 = vector.shape_cast %13 : vector<2x16x8x32xf32> to vector<2x8x2x8x32xf32>
    %15 = vector.extract_strided_slice %14 {offsets = [0, 0, 0, 0, 0], sizes = [2, 8, 1, 8, 32], strides = [1, 1, 1, 1, 1]} : vector<2x8x2x8x32xf32> to vector<2x8x1x8x32xf32>
    %16 = vector.shape_cast %15 : vector<2x8x1x8x32xf32> to vector<2x8x8x32xf32>
    %17 = vector.shape_cast %16 : vector<2x8x8x32xf32> to vector<128x32xf32>
    %18 = arith.truncf %17 : vector<128x32xf32> to vector<128x32xbf16>
    %c1_12 = arith.constant 1 : index
    %c0_13 = arith.constant 0 : index
    %c0_14 = arith.constant 0 : index
    %19 = vector.load %arg1[%c1_12, %c0_13, %c0_14] : memref<9x32x64xbf16, #tpu.memory_space<vmem>>, vector<1x32x64xbf16>
    %20 = vector.shape_cast %19 : vector<1x32x64xbf16> to vector<32x64xbf16>
    %cst_15 = arith.constant dense<0.000000e+00> : vector<128x64xf32>
    %21 = tpu.matmul %18, %20, %cst_15 {dimension_numbers = #tpu.dot_dimension_numbers<[1], [0], [0], [1], [0, 0, 1, 1], [], []>} : vector<128x32xbf16>, vector<32x64xbf16>, vector<128x64xf32> -> vector<128x64xf32>
    %22 = arith.addf %11, %21 : vector<128x64xf32>
    %c0_16 = arith.constant 0 : index
    %c0_17 = arith.constant 0 : index
    %c0_18 = arith.constant 0 : index
    %c1_19 = arith.constant 1 : index
    %c0_20 = arith.constant 0 : index
    %23 = vector.load %arg0[%c0_16, %c0_17, %c0_18, %c1_19, %c0_20] : memref<2x18x2x9x32xf32, #tpu.memory_space<vmem>>, vector<2x16x1x8x32xf32>
    %24 = vector.shape_cast %23 : vector<2x16x1x8x32xf32> to vector<2x16x8x32xf32>
    %25 = vector.shape_cast %24 : vector<2x16x8x32xf32> to vector<2x8x2x8x32xf32>
    %26 = vector.extract_strided_slice %25 {offsets = [0, 0, 0, 0, 0], sizes = [2, 8, 1, 8, 32], strides = [1, 1, 1, 1, 1]} : vector<2x8x2x8x32xf32> to vector<2x8x1x8x32xf32>
    %27 = vector.shape_cast %26 : vector<2x8x1x8x32xf32> to vector<2x8x8x32xf32>
    %28 = vector.shape_cast %27 : vector<2x8x8x32xf32> to vector<128x32xf32>
    %29 = arith.truncf %28 : vector<128x32xf32> to vector<128x32xbf16>
    %c2 = arith.constant 2 : index
    %c0_21 = arith.constant 0 : index
    %c0_22 = arith.constant 0 : index
    %30 = vector.load %arg1[%c2, %c0_21, %c0_22] : memref<9x32x64xbf16, #tpu.memory_space<vmem>>, vector<1x32x64xbf16>
    %31 = vector.shape_cast %30 : vector<1x32x64xbf16> to vector<32x64xbf16>
    %cst_23 = arith.constant dense<0.000000e+00> : vector<128x64xf32>
    %32 = tpu.matmul %29, %31, %cst_23 {dimension_numbers = #tpu.dot_dimension_numbers<[1], [0], [0], [1], [0, 0, 1, 1], [], []>} : vector<128x32xbf16>, vector<32x64xbf16>, vector<128x64xf32> -> vector<128x64xf32>
    %33 = arith.addf %22, %32 : vector<128x64xf32>
    %c0_24 = arith.constant 0 : index
    %c1_25 = arith.constant 1 : index
    %c0_26 = arith.constant 0 : index
    %c0_27 = arith.constant 0 : index
    %c0_28 = arith.constant 0 : index
    %34 = vector.load %arg0[%c0_24, %c1_25, %c0_26, %c0_27, %c0_28] : memref<2x18x2x9x32xf32, #tpu.memory_space<vmem>>, vector<2x16x1x8x32xf32>
    %35 = vector.shape_cast %34 : vector<2x16x1x8x32xf32> to vector<2x16x8x32xf32>
    %36 = vector.shape_cast %35 : vector<2x16x8x32xf32> to vector<2x8x2x8x32xf32>
    %37 = vector.extract_strided_slice %36 {offsets = [0, 0, 0, 0, 0], sizes = [2, 8, 1, 8, 32], strides = [1, 1, 1, 1, 1]} : vector<2x8x2x8x32xf32> to vector<2x8x1x8x32xf32>
    %38 = vector.shape_cast %37 : vector<2x8x1x8x32xf32> to vector<2x8x8x32xf32>
    %39 = vector.shape_cast %38 : vector<2x8x8x32xf32> to vector<128x32xf32>
    %40 = arith.truncf %39 : vector<128x32xf32> to vector<128x32xbf16>
    %c3 = arith.constant 3 : index
    %c0_29 = arith.constant 0 : index
    %c0_30 = arith.constant 0 : index
    %41 = vector.load %arg1[%c3, %c0_29, %c0_30] : memref<9x32x64xbf16, #tpu.memory_space<vmem>>, vector<1x32x64xbf16>
    %42 = vector.shape_cast %41 : vector<1x32x64xbf16> to vector<32x64xbf16>
    %cst_31 = arith.constant dense<0.000000e+00> : vector<128x64xf32>
    %43 = tpu.matmul %40, %42, %cst_31 {dimension_numbers = #tpu.dot_dimension_numbers<[1], [0], [0], [1], [0, 0, 1, 1], [], []>} : vector<128x32xbf16>, vector<32x64xbf16>, vector<128x64xf32> -> vector<128x64xf32>
    %44 = arith.addf %33, %43 : vector<128x64xf32>
    %c0_32 = arith.constant 0 : index
    %c1_33 = arith.constant 1 : index
    %c1_34 = arith.constant 1 : index
    %c0_35 = arith.constant 0 : index
    %c0_36 = arith.constant 0 : index
    %45 = vector.load %arg0[%c0_32, %c1_33, %c1_34, %c0_35, %c0_36] : memref<2x18x2x9x32xf32, #tpu.memory_space<vmem>>, vector<2x16x1x8x32xf32>
    %46 = vector.shape_cast %45 : vector<2x16x1x8x32xf32> to vector<2x16x8x32xf32>
    %47 = vector.shape_cast %46 : vector<2x16x8x32xf32> to vector<2x8x2x8x32xf32>
    %48 = vector.extract_strided_slice %47 {offsets = [0, 0, 0, 0, 0], sizes = [2, 8, 1, 8, 32], strides = [1, 1, 1, 1, 1]} : vector<2x8x2x8x32xf32> to vector<2x8x1x8x32xf32>
    %49 = vector.shape_cast %48 : vector<2x8x1x8x32xf32> to vector<2x8x8x32xf32>
    %50 = vector.shape_cast %49 : vector<2x8x8x32xf32> to vector<128x32xf32>
    %51 = arith.truncf %50 : vector<128x32xf32> to vector<128x32xbf16>
    %c4 = arith.constant 4 : index
    %c0_37 = arith.constant 0 : index
    %c0_38 = arith.constant 0 : index
    %52 = vector.load %arg1[%c4, %c0_37, %c0_38] : memref<9x32x64xbf16, #tpu.memory_space<vmem>>, vector<1x32x64xbf16>
    %53 = vector.shape_cast %52 : vector<1x32x64xbf16> to vector<32x64xbf16>
    %cst_39 = arith.constant dense<0.000000e+00> : vector<128x64xf32>
    %54 = tpu.matmul %51, %53, %cst_39 {dimension_numbers = #tpu.dot_dimension_numbers<[1], [0], [0], [1], [0, 0, 1, 1], [], []>} : vector<128x32xbf16>, vector<32x64xbf16>, vector<128x64xf32> -> vector<128x64xf32>
    %55 = arith.addf %44, %54 : vector<128x64xf32>
    %c0_40 = arith.constant 0 : index
    %c1_41 = arith.constant 1 : index
    %c0_42 = arith.constant 0 : index
    %c1_43 = arith.constant 1 : index
    %c0_44 = arith.constant 0 : index
    %56 = vector.load %arg0[%c0_40, %c1_41, %c0_42, %c1_43, %c0_44] : memref<2x18x2x9x32xf32, #tpu.memory_space<vmem>>, vector<2x16x1x8x32xf32>
    %57 = vector.shape_cast %56 : vector<2x16x1x8x32xf32> to vector<2x16x8x32xf32>
    %58 = vector.shape_cast %57 : vector<2x16x8x32xf32> to vector<2x8x2x8x32xf32>
    %59 = vector.extract_strided_slice %58 {offsets = [0, 0, 0, 0, 0], sizes = [2, 8, 1, 8, 32], strides = [1, 1, 1, 1, 1]} : vector<2x8x2x8x32xf32> to vector<2x8x1x8x32xf32>
    %60 = vector.shape_cast %59 : vector<2x8x1x8x32xf32> to vector<2x8x8x32xf32>
    %61 = vector.shape_cast %60 : vector<2x8x8x32xf32> to vector<128x32xf32>
    %62 = arith.truncf %61 : vector<128x32xf32> to vector<128x32xbf16>
    %c5 = arith.constant 5 : index
    %c0_45 = arith.constant 0 : index
    %c0_46 = arith.constant 0 : index
    %63 = vector.load %arg1[%c5, %c0_45, %c0_46] : memref<9x32x64xbf16, #tpu.memory_space<vmem>>, vector<1x32x64xbf16>
    %64 = vector.shape_cast %63 : vector<1x32x64xbf16> to vector<32x64xbf16>
    %cst_47 = arith.constant dense<0.000000e+00> : vector<128x64xf32>
    %65 = tpu.matmul %62, %64, %cst_47 {dimension_numbers = #tpu.dot_dimension_numbers<[1], [0], [0], [1], [0, 0, 1, 1], [], []>} : vector<128x32xbf16>, vector<32x64xbf16>, vector<128x64xf32> -> vector<128x64xf32>
    %66 = arith.addf %55, %65 : vector<128x64xf32>
    %c0_48 = arith.constant 0 : index
    %c2_49 = arith.constant 2 : index
    %c0_50 = arith.constant 0 : index
    %c0_51 = arith.constant 0 : index
    %c0_52 = arith.constant 0 : index
    %67 = vector.load %arg0[%c0_48, %c2_49, %c0_50, %c0_51, %c0_52] : memref<2x18x2x9x32xf32, #tpu.memory_space<vmem>>, vector<2x16x1x8x32xf32>
    %68 = vector.shape_cast %67 : vector<2x16x1x8x32xf32> to vector<2x16x8x32xf32>
    %69 = vector.shape_cast %68 : vector<2x16x8x32xf32> to vector<2x8x2x8x32xf32>
    %70 = vector.extract_strided_slice %69 {offsets = [0, 0, 0, 0, 0], sizes = [2, 8, 1, 8, 32], strides = [1, 1, 1, 1, 1]} : vector<2x8x2x8x32xf32> to vector<2x8x1x8x32xf32>
    %71 = vector.shape_cast %70 : vector<2x8x1x8x32xf32> to vector<2x8x8x32xf32>
    %72 = vector.shape_cast %71 : vector<2x8x8x32xf32> to vector<128x32xf32>
    %73 = arith.truncf %72 : vector<128x32xf32> to vector<128x32xbf16>
    %c6 = arith.constant 6 : index
    %c0_53 = arith.constant 0 : index
    %c0_54 = arith.constant 0 : index
    %74 = vector.load %arg1[%c6, %c0_53, %c0_54] : memref<9x32x64xbf16, #tpu.memory_space<vmem>>, vector<1x32x64xbf16>
    %75 = vector.shape_cast %74 : vector<1x32x64xbf16> to vector<32x64xbf16>
    %cst_55 = arith.constant dense<0.000000e+00> : vector<128x64xf32>
    %76 = tpu.matmul %73, %75, %cst_55 {dimension_numbers = #tpu.dot_dimension_numbers<[1], [0], [0], [1], [0, 0, 1, 1], [], []>} : vector<128x32xbf16>, vector<32x64xbf16>, vector<128x64xf32> -> vector<128x64xf32>
    %77 = arith.addf %66, %76 : vector<128x64xf32>
    %c0_56 = arith.constant 0 : index
    %c2_57 = arith.constant 2 : index
    %c1_58 = arith.constant 1 : index
    %c0_59 = arith.constant 0 : index
    %c0_60 = arith.constant 0 : index
    %78 = vector.load %arg0[%c0_56, %c2_57, %c1_58, %c0_59, %c0_60] : memref<2x18x2x9x32xf32, #tpu.memory_space<vmem>>, vector<2x16x1x8x32xf32>
    %79 = vector.shape_cast %78 : vector<2x16x1x8x32xf32> to vector<2x16x8x32xf32>
    %80 = vector.shape_cast %79 : vector<2x16x8x32xf32> to vector<2x8x2x8x32xf32>
    %81 = vector.extract_strided_slice %80 {offsets = [0, 0, 0, 0, 0], sizes = [2, 8, 1, 8, 32], strides = [1, 1, 1, 1, 1]} : vector<2x8x2x8x32xf32> to vector<2x8x1x8x32xf32>
    %82 = vector.shape_cast %81 : vector<2x8x1x8x32xf32> to vector<2x8x8x32xf32>
    %83 = vector.shape_cast %82 : vector<2x8x8x32xf32> to vector<128x32xf32>
    %84 = arith.truncf %83 : vector<128x32xf32> to vector<128x32xbf16>
    %c7 = arith.constant 7 : index
    %c0_61 = arith.constant 0 : index
    %c0_62 = arith.constant 0 : index
    %85 = vector.load %arg1[%c7, %c0_61, %c0_62] : memref<9x32x64xbf16, #tpu.memory_space<vmem>>, vector<1x32x64xbf16>
    %86 = vector.shape_cast %85 : vector<1x32x64xbf16> to vector<32x64xbf16>
    %cst_63 = arith.constant dense<0.000000e+00> : vector<128x64xf32>
    %87 = tpu.matmul %84, %86, %cst_63 {dimension_numbers = #tpu.dot_dimension_numbers<[1], [0], [0], [1], [0, 0, 1, 1], [], []>} : vector<128x32xbf16>, vector<32x64xbf16>, vector<128x64xf32> -> vector<128x64xf32>
    %88 = arith.addf %77, %87 : vector<128x64xf32>
    %c0_64 = arith.constant 0 : index
    %c2_65 = arith.constant 2 : index
    %c0_66 = arith.constant 0 : index
    %c1_67 = arith.constant 1 : index
    %c0_68 = arith.constant 0 : index
    %89 = vector.load %arg0[%c0_64, %c2_65, %c0_66, %c1_67, %c0_68] : memref<2x18x2x9x32xf32, #tpu.memory_space<vmem>>, vector<2x16x1x8x32xf32>
    %90 = vector.shape_cast %89 : vector<2x16x1x8x32xf32> to vector<2x16x8x32xf32>
    %91 = vector.shape_cast %90 : vector<2x16x8x32xf32> to vector<2x8x2x8x32xf32>
    %92 = vector.extract_strided_slice %91 {offsets = [0, 0, 0, 0, 0], sizes = [2, 8, 1, 8, 32], strides = [1, 1, 1, 1, 1]} : vector<2x8x2x8x32xf32> to vector<2x8x1x8x32xf32>
    %93 = vector.shape_cast %92 : vector<2x8x1x8x32xf32> to vector<2x8x8x32xf32>
    %94 = vector.shape_cast %93 : vector<2x8x8x32xf32> to vector<128x32xf32>
    %95 = arith.truncf %94 : vector<128x32xf32> to vector<128x32xbf16>
    %c8 = arith.constant 8 : index
    %c0_69 = arith.constant 0 : index
    %c0_70 = arith.constant 0 : index
    %96 = vector.load %arg1[%c8, %c0_69, %c0_70] : memref<9x32x64xbf16, #tpu.memory_space<vmem>>, vector<1x32x64xbf16>
    %97 = vector.shape_cast %96 : vector<1x32x64xbf16> to vector<32x64xbf16>
    %cst_71 = arith.constant dense<0.000000e+00> : vector<128x64xf32>
    %98 = tpu.matmul %95, %97, %cst_71 {dimension_numbers = #tpu.dot_dimension_numbers<[1], [0], [0], [1], [0, 0, 1, 1], [], []>} : vector<128x32xbf16>, vector<32x64xbf16>, vector<128x64xf32> -> vector<128x64xf32>
    %99 = arith.addf %88, %98 : vector<128x64xf32>
    %c0_72 = arith.constant 0 : index
    %c0_73 = arith.constant 0 : index
    %100 = vector.load %arg2[%c0_72, %c0_73] : memref<1x64xf32, #tpu.memory_space<vmem>>, vector<1x64xf32>
    %101 = vector.broadcast %100 : vector<1x64xf32> to vector<128x64xf32>
    %102 = arith.addf %99, %101 : vector<128x64xf32>
    %cst_74 = arith.constant 0.000000e+00 : f32
    %103 = vector.broadcast %cst_74 : f32 to vector<128x64xf32>
    %104 = arith.subf %103, %102 : vector<128x64xf32>
    %105 = math.exp %104 : vector<128x64xf32>
    %cst_75 = arith.constant 1.000000e+00 : f32
    %106 = vector.broadcast %cst_75 : f32 to vector<128x64xf32>
    %107 = arith.addf %106, %105 : vector<128x64xf32>
    %108 = tpu.reciprocal %107 {approx = true} : vector<128x64xf32> -> vector<128x64xf32>
    %109 = arith.mulf %102, %108 : vector<128x64xf32>
    %c0_76 = arith.constant 0 : index
    %c0_77 = arith.constant 0 : index
    %110 = vector.load %arg3[%c0_76, %c0_77] : memref<128x64xf32, #tpu.memory_space<vmem>>, vector<128x64xf32>
    tpu.vector_store %arg3[%c0_76, %c0_77], %109 {strides = array<i32>} : memref<128x64xf32, #tpu.memory_space<vmem>>, vector<128x64xf32>,
    return
  }
}

</mosaic_0001>

<bundles_post_ra>
// kernel: bu1_forward.1
= control target key start
LH: loop header
LB: loop body
LE: loop exit
PB: predicated region body
PF: predicated region fallthrough
CT: control target
= control target key end

     0   :  { %vm86_vm0 = vcmask 261120   ;;  %s3311_s0 = inlined_call_operand.vmem [shape: f32[2,18,2,9,32], index: 0, kind: input, shape index: {}]   ;;  %s3312_s1 = inlined_call_operand.vmem [shape: bf16[9,32,64], index: 1, kind: input, shape index: {}]   ;;  %s3313_s2 = inlined_call_operand.vmem [shape: f32[1,64], index: 2, kind: input, shape index: {}]   ;;  %s3314_s3 = inlined_call_operand.hbm [shape: f32[128,64], index: 3, kind: output, shape index: {}]  }
   0x1   :  { %v2255_v0 = vld [vmem:[%s3312_s1 + $0x18] sm:$0xff]   ;;  %v2256_v1 = vld [vmem:[%s3312_s1 + $0x10] sm:$0xff]   ;;  %v2257_v13 = vld [vmem:[%s3312_s1 + $0x8] sm:$0xff]  }
   0x2   :  { %2068 = vmatprep.subr.bf16.mxu0 %v2255_v0  ;;  %2248 = vmatprep.subr.bf16.mxu1 %v2255_v0  ;;  %v1743_v2 = vld [vmem:[%s3311_s0 + $0x10] sm:$0xff]  ;;  %v2258_v17 = vld [vmem:[%s3312_s1 + $0x28] sm:$0xff]   ;;  %v2259_v30 = vld [vmem:[%s3312_s1] sm:$0xff]  }
   0x3   :  { %v2394_v3 = vld [vmem:[%s3311_s0 + $0x50] sm:$0xff]  ;;  %2069 = vmatpush3.bf16.msra.mxu0 %v2255_v0  ;;  %2250 = vmatpush3.bf16.msra.mxu1 %v2255_v0  ;;  %v2260_v33 = vld [vmem:[%s3312_s1 + $0x20] sm:$0xff]   ;;  %v2261_v41 = vld [vmem:[%s3312_s1 + $0x38] sm:$0xff]  }
   0x4   :  { %v1751_v4 = vld [vmem:[%s3311_s0 + $0x250] sm:$0xff]  ;;  %v61_v5 = vpack.c.bf16 %v2394_v3, %v1743_v2  ;;  %2070 = vmatprep.subr.bf16.mxu0 %v2256_v1  ;;  %2249 = vmatprep.subr.bf16.mxu1 %v2256_v1  ;;  %v16_v34 = vld [vmem:[%s3311_s0] sm:$0xff]  ;;  %v2262_v45 = vld [vmem:[%s3312_s1 + $0x48] sm:$0xff]  }
   0x5   :  { %v2403_v6 = vld [vmem:[%s3311_s0 + $0x290] sm:$0xff]  ;;  %v2510_v35 = vld [vmem:[%s3311_s0 + $0x40] sm:$0xff] }
   0x6   :  { %v2408_v7 = vld [vmem:[%s3311_s0 + $0x90] sm:$0xff]  ;;  %v65_v9 = vpack.c.bf16 %v2403_v6, %v1751_v4  ;;  %2072 = vmatprep.mubr.msk.bf16.mxu0 %vm86_vm0, %v61_v5  ;;  %v341_v36 = vld [vmem:[%s3311_s0 + $0x1] sm:$0xff]  ;;  %v32_v43 = vpack.c.bf16 %v2510_v35, %v16_v34 }
   0x7   :  { %v2413_v8 = vld [vmem:[%s3311_s0 + $0xd0] sm:$0xff]  ;;  %v1251_v12 = vpack.c.bf16 %v2408_v7, %v2394_v3  ;;  %2071 = vmatpush3.bf16.msra.mxu0 %v2256_v1  ;;  %2251 = vmatpush3.bf16.msra.mxu1 %v2256_v1  ;;  %v2518_v37 = vld [vmem:[%s3311_s0 + $0x41] sm:$0xff] }
   0x8   :  { %v2419_v10 = vld [vmem:[%s3311_s0 + $0x2d0] sm:$0xff]  ;;  %2080 = vmatprep.mubr.msk.bf16.mxu1 %vm86_vm0, %v65_v9  ;;  %v62_v15 = vpack.c.bf16 %v2413_v8, %v2408_v7  ;;  %2088 = vmatprep.subr.bf16.mxu1 %v2257_v13  ;;  %v2523_v38 = vld [vmem:[%s3311_s0 + $0x81] sm:$0xff]  ;;  %v357_v44 = vpack.c.bf16 %v2518_v37, %v341_v36 }
   0x9   :  { %v2424_v11 = vld [vmem:[%s3311_s0 + $0x310] sm:$0xff]  ;;  %2108 = vmatprep.subr.bf16.mxu0 %v2258_v17  ;;  %v1429_v42 = vpack.c.bf16 %v2523_v38, %v2518_v37  ;;  %v2542_v46 = vld [vmem:[%s3311_s0 + $0xc1] sm:$0xff] }
   0xa   :  { %v66_v16 = vpack.c.bf16 %v2424_v11, %v2419_v10  ;;  %v2445_v18 = vld [vmem:[%s3311_s0 + $0x110] sm:$0xff]  ;;  %2073 = vmatmul.mubr.msk.bf16.vlgmr.msra.gmra.mxu0 %vm86_vm0, %v62_v15  ;;  %v2547_v47 = vld [vmem:[%s3311_s0 + $0x101] sm:$0xff]  ;;  %v358_v60 = vpack.c.bf16 %v2542_v46, %v2523_v38 }
   0xb   :  { %v2450_v19 = vld [vmem:[%s3311_s0 + $0x150] sm:$0xff]  ;;  %v1252_v22 = vpack.c.bf16 %v2445_v18, %v2413_v8  ;;  %2109 = vmatpush3.bf16.msra.mxu0 %v2258_v17  ;;  %v1430_v48 = vpack.c.bf16 %v2547_v47, %v2542_v46  ;;  %v2556_v49 = vld [vmem:[%s3311_s0 + $0x141] sm:$0xff] }
   0xc   :  { %v2455_v20 = vld [vmem:[%s3311_s0 + $0x350] sm:$0xff]  ;;  %v63_v23 = vpack.c.bf16 %v2450_v19, %v2445_v18  ;;  %2081 = vmatmul.mubr.msk.bf16.vlgmr.msra.gmra.mxu1 %vm86_vm0, %v66_v16  ;;  %2110 = vmatprep.subr.bf16.mxu0 %v2260_v33  ;;  %v2561_v50 = vld [vmem:[%s3311_s0 + $0x181] sm:$0xff]  ;;  %v359_v62 = vpack.c.bf16 %v2556_v49, %v2547_v47 }
   0xd   :  { %v2460_v21 = vld [vmem:[%s3311_s0 + $0x390] sm:$0xff]  ;;  %2089 = vmatpush3.bf16.msra.mxu1 %v2257_v13  ;;  %v2568_v51 = vld [vmem:[%s3311_s0 + $0x80] sm:$0xff] }
   0xe   :  { %v67_v24 = vpack.c.bf16 %v2460_v21, %v2455_v20  ;;  %v2471_v25 = vld [vmem:[%s3311_s0 + $0x190] sm:$0xff]  ;;  %2076 = vmatprep.mubr.msk.bf16.mxu0 %vm86_vm0, %v63_v23  ;;  %2090 = vmatprep.subr.bf16.mxu1 %v2259_v30  ;;  %v2573_v52 = vld [vmem:[%s3311_s0 + $0xc0] sm:$0xff] }
   0xf   :  { %v2478_v27 = vld [vmem:[%s3311_s0 + $0x1d0] sm:$0xff]  ;;  %2111 = vmatpush3.bf16.msra.mxu0 %v2260_v33  ;;  %v2580_v54 = vld [vmem:[%s3311_s0 + $0x100] sm:$0xff]  ;;  %v33_v59 = vpack.c.bf16 %v2573_v52, %v2568_v51  ;;  %v2265_v33 = vld [vmem:[%s3312_s1 + $0x58] sm:$0xff]  }
  0x10   :  { %v2483_v28 = vld [vmem:[%s3311_s0 + $0x3d0] sm:$0xff]  ;;  %2084 = vmatprep.mubr.msk.bf16.mxu1 %vm86_vm0, %v67_v24  ;;  %v64_v39 = vpack.c.bf16 %v2478_v27, %v2471_v25  ;;  %2148 = vmatprep.subr.bf16.mxu0 %v2262_v45  ;;  %v2585_v55 = vld [vmem:[%s3311_s0 + $0x281] sm:$0xff] }
  0x11   :  { %v2497_v32 = vld [vmem:[%s3311_s0 + $0x410] sm:$0xff]  ;;  %2091 = vmatpush3.bf16.msra.mxu1 %v2259_v30  ;;  %v2590_v56 = vld [vmem:[%s3311_s0 + $0x2c1] sm:$0xff] }
  0x12   :  { %v68_v40 = vpack.c.bf16 %v2497_v32, %v2483_v28  ;;  %2128 = vmatprep.subr.bf16.mxu1 %v2261_v41  ;;  %2077 = vmatmul.mubr.msk.bf16.gmra.mxu0 %vm86_vm0, %v64_v39  ;;  %v2595_v57 = vld [vmem:[%s3311_s0 + $0x140] sm:$0xff]  ;;  %v2263_v0 = vld [vmem:[%s3312_s1 + $0x30] sm:$0xff]   ;;  %v2266_v39 = vld [vmem:[%s3312_s1 + $0x68] sm:$0xff]  }
  0x13   :  { %2112 = vmatprep.mubr.msk.bf16.mxu0 %vm86_vm0, %v357_v44  ;;  %v34_v61 = vpack.c.bf16 %v2595_v57, %v2580_v54  ;;  %v2610_v63 = vld [vmem:[%s3311_s0 + $0x301] sm:$0xff] }
  0x14   :  { %2085 = vmatmul.mubr.msk.bf16.gmra.mxu1 %vm86_vm0, %v68_v40  ;;  %v2618_v1 = vld [vmem:[%s3311_s0 + $0x341] sm:$0xff] }
  0x15   :  { %2092 = vmatprep.mubr.msk.bf16.mxu1 %vm86_vm0, %v32_v43  ;;  %v2264_v2 = vld [vmem:[%s3312_s1 + $0x40] sm:$0xff]  }
  0x16   :  { %v2626_v4 = vld [vmem:[%s3311_s0 + $0x381] sm:$0xff] }
  0x17   :  { %v2631_v5 = vld [vmem:[%s3311_s0 + $0x3c1] sm:$0xff] }
  0x18   :  { %v2640_v13 = vld [vmem:[%s3311_s0 + $0x180] sm:$0xff] }
  0x19   :  { %v2647_v16 = vld [vmem:[%s3311_s0 + $0x1c0] sm:$0xff] }
  0x1a   :  { %2113 = vmatmul.mubr.msk.bf16.vlgmr.msra.gmra.mxu0 %vm86_vm0, %v358_v60  ;;  %v2652_v17 = vld [vmem:[%s3311_s0 + $0x1c1] sm:$0xff]  ;;  %v35_v34 = vpack.c.bf16 %v2647_v16, %v2640_v13 }
  0x1b   :  { %2149 = vmatpush3.bf16.msra.mxu0 %v2262_v45  ;;  %v24_v23 = vld [vmem:[%s3311_s0 + $0x240] sm:$0xff]  ;;  %2116 = vmatprep.mubr.msk.bf16.mxu0 %vm86_vm0, %v359_v62  ;;  %v360_v36 = vpack.c.bf16 %v2652_v17, %v2561_v50 }
  0x1c   :  { %2093 = vmatmul.mubr.msk.bf16.vlgmr.msra.gmra.mxu1 %vm86_vm0, %v33_v59  ;;  %v2662_v24 = vld [vmem:[%s3311_s0 + $0x280] sm:$0xff]  ;;  %2150 = vmatprep.subr.bf16.mxu0 %v2264_v2 }
  0x1d   :  { %2129 = vmatpush3.bf16.msra.mxu1 %v2261_v41  ;;  %2096 = vmatprep.mubr.msk.bf16.mxu1 %vm86_vm0, %v34_v61  ;;  %v349_v30 = vld [vmem:[%s3311_s0 + $0x241] sm:$0xff]  ;;  %v36_v40 = vpack.c.bf16 %v2662_v24, %v24_v23  ;;  %v362_v61 = vpack.c.bf16 %v2610_v63, %v2590_v56 }
  0x1e   :  { %2130 = vmatprep.subr.bf16.mxu1 %v2263_v0  ;;  %v361_v41 = vpack.c.bf16 %v2585_v55, %v349_v30  ;;  %v2686_v43 = vld [vmem:[%s3311_s0 + $0x2c0] sm:$0xff] }
  0x1f   :  { %2151 = vmatpush3.bf16.msra.mxu0 %v2264_v2  ;;  %v2691_v44 = vld [vmem:[%s3311_s0 + $0x300] sm:$0xff] }
  0x20   :  { %2188 = vmatprep.subr.bf16.mxu0 %v2266_v39  ;;  %v2696_v45 = vld [vmem:[%s3311_s0 + $0x340] sm:$0xff]  ;;  %v37_v60 = vpack.c.bf16 %v2691_v44, %v2686_v43 }
  0x21   :  { %2131 = vmatpush3.bf16.msra.mxu1 %v2263_v0  ;;  %v2701_v59 = vld [vmem:[%s3311_s0 + $0x380] sm:$0xff]  ;;  %v363_v0 = vpack.c.bf16 %v2626_v4, %v2618_v1 }
  0x22   :  { %2168 = vmatprep.subr.bf16.mxu1 %v2265_v33  ;;  %2117 = vmatmul.mubr.msk.bf16.gmra.mxu0 %vm86_vm0, %v360_v36  ;;  %v38_v62 = vpack.c.bf16 %v2701_v59, %v2696_v45  ;;  %v2714_v2 = vld [vmem:[%s3311_s0 + $0x3c0] sm:$0xff] }
  0x23   :  { %2120 = vmatprep.mubr.msk.bf16.mxu0 %vm86_vm0, %v361_v41  ;;  %v2719_v23 = vld [vmem:[%s3311_s0 + $0x400] sm:$0xff]  ;;  %v1828_v41 = vld [vmem:[%s3311_s0 + $0x70] sm:$0xff] }
  0x24   :  { %2097 = vmatmul.mubr.msk.bf16.gmra.mxu1 %vm86_vm0, %v35_v34  ;;  %v2726_v30 = vld [vmem:[%s3311_s0 + $0x401] sm:$0xff] }
  0x25   :  { %2100 = vmatprep.mubr.msk.bf16.mxu1 %vm86_vm0, %v36_v40  ;;  %v1797_v34 = vld [vmem:[%s3311_s0 + $0x20] sm:$0xff]  ;;  %v1827_v40 = vld [vmem:[%s3311_s0 + $0x30] sm:$0xff] }
  0x26   :  { %v1798_v36 = vld [vmem:[%s3311_s0 + $0x60] sm:$0xff] }
  0x27   :  { %v1799_v15 = vld [vmem:[%s3311_s0 + $0xa0] sm:$0xff] }
  0x28   :  { %v1800_v31 = vld [vmem:[%s3311_s0 + $0xe0] sm:$0xff] }
  0x2a   :  { %2121 = vmatmul.mubr.msk.bf16.gmra.mxu0 %vm86_vm0, %v362_v61  ;;  %v364_v61 = vpack.c.bf16 %v2726_v30, %v2631_v5 }
  0x2b   :  { %2124 = vmatprep.mubr.msk.bf16.mxu0 %vm86_vm0, %v363_v0  ;;  %v715_v0 = vpack.c.bf16 %v1828_v41, %v1827_v40  ;;  %v1801_v40 = vld [vmem:[%s3311_s0 + $0x120] sm:$0xff] }
  0x2c   :  { %2101 = vmatmul.mubr.msk.bf16.gmra.mxu1 %vm86_vm0, %v37_v60  ;;  %v39_v60 = vpack.c.bf16 %v2719_v23, %v2714_v2 }
  0x2d   :  { %2104 = vmatprep.mubr.msk.bf16.mxu1 %vm86_vm0, %v38_v62  ;;  %v536_v62 = vpack.c.bf16 %v1798_v36, %v1797_v34  ;;  %v1829_v34 = vld [vmem:[%s3311_s0 + $0xb0] sm:$0xff] }
  0x2e   :  { %v1830_v36 = vld [vmem:[%s3311_s0 + $0xf0] sm:$0xff] }
  0x32   :  { %2125 = vmatmul.mubr.msk.bf16.gmra.mxu0 %vm86_vm0, %v364_v61 }
  0x33   :  { %2152 = vmatprep.mubr.msk.bf16.mxu0 %vm86_vm0, %v715_v0 }
  0x34   :  { %2105 = vmatmul.mubr.msk.bf16.gmra.mxu1 %vm86_vm0, %v39_v60 }
  0x35   :  { %2132 = vmatprep.mubr.msk.bf16.mxu1 %vm86_vm0, %v536_v62 }
  0x36   :  { %8 = vsyncpa [#allocation3], 0  ;;  %v1802_v41 = vld [vmem:[%s3311_s0 + $0x160] sm:$0xff]  ;;  %v1831_v60 = vld [vmem:[%s3311_s0 + $0x130] sm:$0xff]  ;;  %v537_v62 = vpack.c.bf16 %v1800_v31, %v1799_v15  ;;  %v716_v0 = vpack.c.bf16 %v1830_v36, %v1829_v34  ;;  %v3315_v3 = vpack.c.bf16 %v2471_v25, %v2450_v19  ;;  %v3316_v7 = vpack.c.bf16 %v2561_v50, %v2556_v49 }
  0x37   :  { %v1832_v61 = vld [vmem:[%s3311_s0 + $0x170] sm:$0xff]  ;;  %v538_v9 = vpack.c.bf16 %v1802_v41, %v1801_v40  ;;  %v1803_v58 = vld [vmem:[%s3311_s0 + $0x1a0] sm:$0xff]  ;;  %v3317_v19 = vpack.c.bf16 %v2419_v10, %v2403_v6  ;;  %v3318_v25 = vpack.c.bf16 %v2590_v56, %v2585_v55  ;;  %v3319_v37 = vpack.c.bf16 %v2455_v20, %v2424_v11 }
  0x38   :  { %v717_v26 = vpack.c.bf16 %v1832_v61, %v1831_v60  ;;  %v2267_v14 = vld [vmem:[%s3312_s1 + $0x50] sm:$0xff]   ;;  %v2268_v53 = vld [vmem:[%s3312_s1 + $0x60] sm:$0xff]   ;;  %v2270_v60 = vld [vmem:[%s3312_s1 + $0x88] sm:$0xff]   ;;  %v3321_v6 = vpack.c.bf16 %v2483_v28, %v2460_v21  ;;  %v3322_v10 = vpack.c.bf16 %v2631_v5, %v2626_v4  ;;  %vm1710_vm1 = vcmask 523264  }
  0x39   :  { %v1804_v31 = vld [vmem:[%s3311_s0 + $0x1e0] sm:$0xff]  ;;  %v1833_v15 = vld [vmem:[%s3311_s0 + $0x1b0] sm:$0xff] }
  0x3a   :  { %2153 = vmatmul.mubr.msk.bf16.vlgmr.msra.gmra.mxu0 %vm86_vm0, %v716_v0  ;;  %v1834_v34 = vld [vmem:[%s3311_s0 + $0x1f0] sm:$0xff]  ;;  %v1805_v36 = vld [vmem:[%s3311_s0 + $0x260] sm:$0xff]  ;;  %v539_v61 = vpack.c.bf16 %v1804_v31, %v1803_v58 }
  0x3b   :  { %2189 = vmatpush3.bf16.msra.mxu0 %v2266_v39  ;;  %v1806_v40 = vld [vmem:[%s3311_s0 + $0x2a0] sm:$0xff]  ;;  %v1835_v41 = vld [vmem:[%s3311_s0 + $0x270] sm:$0xff]  ;;  %2156 = vmatprep.mubr.msk.bf16.mxu0 %vm86_vm0, %v717_v26  ;;  %v2269_v39 = vld [vmem:[%s3312_s1 + $0x78] sm:$0xff]  }
  0x3c   :  { %2133 = vmatmul.mubr.msk.bf16.vlgmr.msra.gmra.mxu1 %vm86_vm0, %v537_v62  ;;  %2190 = vmatprep.subr.bf16.mxu0 %v2268_v53  ;;  %v718_v62 = vpack.c.bf16 %v1834_v34, %v1833_v15  ;;  %v540_v0 = vpack.c.bf16 %v1806_v40, %v1805_v36  ;;  %v1807_v26 = vld [vmem:[%s3311_s0 + $0x2e0] sm:$0xff]  ;;  %v1839_v15 = vld [vmem:[%s3311_s0 + $0x370] sm:$0xff] }
  0x3d   :  { %2169 = vmatpush3.bf16.msra.mxu1 %v2265_v33  ;;  %2136 = vmatprep.mubr.msk.bf16.mxu1 %vm86_vm0, %v538_v9  ;;  %v1836_v33 = vld [vmem:[%s3311_s0 + $0x2b0] sm:$0xff]  ;;  %v1808_v29 = vld [vmem:[%s3311_s0 + $0x320] sm:$0xff] }
  0x3e   :  { %2170 = vmatprep.subr.bf16.mxu1 %v2267_v14  ;;  %v719_v9 = vpack.c.bf16 %v1836_v33, %v1835_v41  ;;  %v1809_v58 = vld [vmem:[%s3311_s0 + $0x360] sm:$0xff]  ;;  %v1840_v34 = vld [vmem:[%s3311_s0 + $0x3b0] sm:$0xff]  ;;  %v541_v36 = vpack.c.bf16 %v1808_v29, %v1807_v26 }
  0x3f   :  { %2191 = vmatpush3.bf16.msra.mxu0 %v2268_v53  ;;  %v1838_v53 = vld [vmem:[%s3311_s0 + $0x330] sm:$0xff]  ;;  %v1810_v31 = vld [vmem:[%s3311_s0 + $0x3a0] sm:$0xff]  ;;  %v721_v33 = vpack.c.bf16 %v1840_v34, %v1839_v15 }
  0x40   :  { %2228 = vmatprep.subr.bf16.mxu0 %v2270_v60  ;;  %v542_v41 = vpack.c.bf16 %v1810_v31, %v1809_v58  ;;  %v1841_v29 = vld [vmem:[%s3311_s0 + $0x3f0] sm:$0xff]  ;;  %v1858_v26 = vld [vmem:[%s3311_s0 + $0x61] sm:$0xff]  ;;  %v1072_v31 = vpack.c.bf16 %v2568_v51, %v2510_v35 }
  0x41   :  { %2171 = vmatpush3.bf16.msra.mxu1 %v2267_v14  ;;  %v1837_v14 = vld [vmem:[%s3311_s0 + $0x2f0] sm:$0xff]  ;;  %v1859_v15 = vld [vmem:[%s3311_s0 + $0xa1] sm:$0xff] }
  0x42   :  { %2208 = vmatprep.subr.bf16.mxu1 %v2269_v39  ;;  %2157 = vmatmul.mubr.msk.bf16.gmra.mxu0 %vm86_vm0, %v718_v62  ;;  %v720_v40 = vpack.c.bf16 %v1838_v53, %v1837_v14  ;;  %v1812_v62 = vld [vmem:[%s3311_s0 + $0x420] sm:$0xff]  ;;  %v1924_v8 = vld [vmem:[%s3311_s0 + $0x210] sm:$0xff] }
  0x43   :  { %2160 = vmatprep.mubr.msk.bf16.mxu0 %vm86_vm0, %v719_v9  ;;  %v1857_v9 = vld [vmem:[%s3311_s0 + $0x21] sm:$0xff]  ;;  %v1254_v18 = vpack.c.bf16 %v1924_v8, %v2478_v27  ;;  %v3320_v27 = vpack.c.bf16 %v2618_v1, %v2610_v63  ;;  %v1932_v11 = vld [vmem:[%s3311_s0 + $0x450] sm:$0xff] }
  0x44   :  { %2137 = vmatmul.mubr.msk.bf16.gmra.mxu1 %vm86_vm0, %v539_v61  ;;  %v1811_v61 = vld [vmem:[%s3311_s0 + $0x3e0] sm:$0xff]  ;;  %v893_v58 = vpack.c.bf16 %v1858_v26, %v1857_v9  ;;  %v1076_v9 = vpack.c.bf16 %v2686_v43, %v2662_v24  ;;  %v1258_v38 = vpack.c.bf16 %v1932_v11, %v2497_v32 }
  0x45   :  { %2140 = vmatprep.mubr.msk.bf16.mxu1 %vm86_vm0, %v540_v0  ;;  %v1842_v0 = vld [vmem:[%s3311_s0 + $0x430] sm:$0xff]  ;;  %v543_v14 = vpack.c.bf16 %v1812_v62, %v1811_v61  ;;  %v1860_v34 = vld [vmem:[%s3311_s0 + $0xe1] sm:$0xff] }
  0x46   :  { %v722_v53 = vpack.c.bf16 %v1842_v0, %v1841_v29  ;;  %v1861_v35 = vld [vmem:[%s3311_s0 + $0x121] sm:$0xff]  ;;  %v2271_v61 = vld [vmem:[%s3312_s1 + $0x70] sm:$0xff]  }
  0x47   :  { %v1862_v51 = vld [vmem:[%s3311_s0 + $0x161] sm:$0xff] }
  0x48   :  { %v2272_v62 = vld [vmem:[%s3312_s1 + $0x80] sm:$0xff]  }
  0x49   :  { %v1867_v26 = vld [vmem:[%s3311_s0 + $0x2e1] sm:$0xff] }
  0x4a   :  { %2161 = vmatmul.mubr.msk.bf16.gmra.mxu0 %vm86_vm0, %v720_v40  ;;  %v1073_v40 = vpack.c.bf16 %v2580_v54, %v2573_v52  ;;  %v1863_v52 = vld [vmem:[%s3311_s0 + $0x1a1] sm:$0xff] }
  0x4b   :  { %2164 = vmatprep.mubr.msk.bf16.mxu0 %vm86_vm0, %v721_v33  ;;  %v1074_v33 = vpack.c.bf16 %v2640_v13, %v2595_v57  ;;  %v1864_v54 = vld [vmem:[%s3311_s0 + $0x1e1] sm:$0xff] }
  0x4c   :  { %2141 = vmatmul.mubr.msk.bf16.gmra.mxu1 %vm86_vm0, %v541_v36  ;;  %v894_v36 = vpack.c.bf16 %v1860_v34, %v1859_v15  ;;  %v1894_v57 = vld [vmem:[%s3311_s0 + $0x200] sm:$0xff] }
  0x4d   :  { %2144 = vmatprep.mubr.msk.bf16.mxu1 %vm86_vm0, %v542_v41  ;;  %v895_v41 = vpack.c.bf16 %v1862_v51, %v1861_v35  ;;  %v1865_v13 = vld [vmem:[%s3311_s0 + $0x261] sm:$0xff]  ;;  %v1075_v29 = vpack.c.bf16 %v1894_v57, %v2647_v16 }
  0x4e   :  { %v1868_v16 = vld [vmem:[%s3311_s0 + $0x321] sm:$0xff] }
  0x4f   :  { %v1869_v24 = vld [vmem:[%s3311_s0 + $0x361] sm:$0xff] }
  0x50   :  { %v1870_v43 = vld [vmem:[%s3311_s0 + $0x3a1] sm:$0xff] }
  0x51   :  { %v1871_v15 = vld [vmem:[%s3311_s0 + $0x3e1] sm:$0xff] }
  0x52   :  { %2165 = vmatmul.mubr.msk.bf16.gmra.mxu0 %vm86_vm0, %v722_v53  ;;  %v1077_v53 = vpack.c.bf16 %v2696_v45, %v2691_v44  ;;  %v1872_v44 = vld [vmem:[%s3311_s0 + $0x421] sm:$0xff] }
  0x53   :  { %2192 = vmatprep.mubr.msk.bf16.mxu0 %vm86_vm0, %v1072_v31  ;;  %v1078_v31 = vpack.c.bf16 %v2714_v2, %v2701_v59  ;;  %v1902_v45 = vld [vmem:[%s3311_s0 + $0x440] sm:$0xff]  ;;  %v900_v59 = vpack.c.bf16 %v1872_v44, %v1871_v15 }
  0x54   :  { %2145 = vmatmul.mubr.msk.bf16.gmra.mxu1 %vm86_vm0, %v543_v14  ;;  %v898_v14 = vpack.c.bf16 %v1868_v16, %v1867_v26  ;;  %v1079_v2 = vpack.c.bf16 %v1902_v45, %v2719_v23  ;;  %v1962_v20 = vld [vmem:[%s3311_s0 + $0x441] sm:$0xff] }
  0x55   :  { %2172 = vmatprep.mubr.msk.bf16.mxu1 %vm86_vm0, %v893_v58  ;;  %v899_v58 = vpack.c.bf16 %v1870_v43, %v1869_v24 }
  0x5a   :  { %2193 = vmatmul.mubr.msk.bf16.vlgmr.msra.gmra.mxu0 %vm86_vm0, %v1073_v40 }
  0x5b   :  { %2229 = vmatpush3.bf16.msra.mxu0 %v2270_v60  ;;  %2196 = vmatprep.mubr.msk.bf16.mxu0 %vm86_vm0, %v1074_v33  ;;  %v896_v60 = vpack.c.bf16 %v1864_v54, %v1863_v52 }
  0x5c   :  { %2173 = vmatmul.mubr.msk.bf16.vlgmr.msra.gmra.mxu1 %vm86_vm0, %v894_v36  ;;  %2230 = vmatprep.subr.bf16.mxu0 %v2272_v62 }
  0x5d   :  { %2209 = vmatpush3.bf16.msra.mxu1 %v2269_v39  ;;  %2176 = vmatprep.mubr.msk.bf16.mxu1 %vm86_vm0, %v895_v41  ;;  %v1866_v39 = vld [vmem:[%s3311_s0 + $0x2a1] sm:$0xff] }
  0x5e   :  { %2210 = vmatprep.subr.bf16.mxu1 %v2271_v61  ;;  %v897_v0 = vpack.c.bf16 %v1866_v39, %v1865_v13 }
  0x5f   :  { %2231 = vmatpush3.bf16.msra.mxu0 %v2272_v62 }
  0x61   :  { %2211 = vmatpush3.bf16.msra.mxu1 %v2271_v61 }
  0x62   :  { %2197 = vmatmul.mubr.msk.bf16.gmra.mxu0 %vm86_vm0, %v1075_v29 }
  0x63   :  { %2200 = vmatprep.mubr.msk.bf16.mxu0 %vm86_vm0, %v1076_v9 }
  0x64   :  { %2177 = vmatmul.mubr.msk.bf16.gmra.mxu1 %vm86_vm0, %v896_v60 }
  0x65   :  { %2180 = vmatprep.mubr.msk.bf16.mxu1 %vm86_vm0, %v897_v0 }
  0x6a   :  { %2201 = vmatmul.mubr.msk.bf16.gmra.mxu0 %vm86_vm0, %v1077_v53 }
  0x6b   :  { %2204 = vmatprep.mubr.msk.bf16.mxu0 %vm86_vm0, %v1078_v31 }
  0x6c   :  { %2181 = vmatmul.mubr.msk.bf16.gmra.mxu1 %vm86_vm0, %v898_v14 }
  0x6d   :  { %2184 = vmatprep.mubr.msk.bf16.mxu1 %vm86_vm0, %v899_v58 }
  0x72   :  { %2205 = vmatmul.mubr.msk.bf16.gmra.mxu0 %vm86_vm0, %v1079_v2 }
  0x73   :  { %2232 = vmatprep.mubr.msk.bf16.mxu0 %vm86_vm0, %v1429_v42  ;;  %v1436_v42 = vpack.c.bf16 %v1962_v20, %v2726_v30 }
  0x74   :  { %2185 = vmatmul.mubr.msk.bf16.gmra.mxu1 %vm86_vm0, %v900_v59 }
  0x75   :  { %2212 = vmatprep.mubr.msk.bf16.mxu1 %vm86_vm0, %v1251_v12  ;;  %v1954_v12 = vld [vmem:[%s3311_s0 + $0x201] sm:$0xff] }
  0x7a   :  { %2233 = vmatmul.mubr.msk.bf16.vlgmr.msra.gmra.mxu0 %vm86_vm0, %v1430_v48 }
  0x7b   :  { %2236 = vmatprep.mubr.msk.bf16.mxu0 %vm86_vm0, %v3316_v7 }
  0x7c   :  { %2213 = vmatmul.mubr.msk.bf16.vlgmr.msra.gmra.mxu1 %vm86_vm0, %v1252_v22  ;;  %v1432_v22 = vpack.c.bf16 %v1954_v12, %v2652_v17 }
  0x7d   :  { %2216 = vmatprep.mubr.msk.bf16.mxu1 %vm86_vm0, %v3315_v3 }
  0x82   :  { %2237 = vmatmul.mubr.msk.bf16.gmra.mxu0 %vm86_vm0, %v1432_v22 }
  0x83   :  { %2240 = vmatprep.mubr.msk.bf16.mxu0 %vm86_vm0, %v3318_v25 }
  0x84   :  { %2217 = vmatmul.mubr.msk.bf16.gmra.mxu1 %vm86_vm0, %v1254_v18 }
  0x85   :  { %2220 = vmatprep.mubr.msk.bf16.mxu1 %vm86_vm0, %v3317_v19 }
  0x8a   :  { %2241 = vmatmul.mubr.msk.bf16.gmra.mxu0 %vm86_vm0, %v3320_v27 }
  0x8b   :  { %2244 = vmatprep.mubr.msk.bf16.mxu0 %vm86_vm0, %v3322_v10 }
  0x8c   :  { %2221 = vmatmul.mubr.msk.bf16.gmra.mxu1 %vm86_vm0, %v3319_v37 }
  0x8d   :  { %2224 = vmatprep.mubr.msk.bf16.mxu1 %vm86_vm0, %v3321_v6 }
  0x92   :  { %2245 = vmatmul.mubr.msk.bf16.gmra.mxu0 %vm86_vm0, %v1436_v42 }
  0x94   :  { %2225 = vmatmul.mubr.msk.bf16.gmra.mxu1 %vm86_vm0, %v1258_v38 }
  0xca   :  { %v2074_v21 = vpop.f32.mrf.mxu0 }
  0xcc   :  { %v2082_v28 = vpop.f32.mrf.mxu1  ;;  %v145_v46 = vpop.f32.mrf.mxu0 }
  0xce   :  { %v177_v47 = vpop.f32.mrf.mxu1  ;;  %v2075_v48 = vpop.f32.mrf.mxu0 }
  0xd0   :  { %v2083_v49 = vpop.f32.mrf.mxu1  ;;  %v148_v50 = vpop.f32.mrf.mxu0 }
  0xd2   :  { %v180_v55 = vpop.f32.mrf.mxu1  ;;  %v2078_v56 = vpop.f32.mrf.mxu0 }
  0xd4   :  { %v2086_v63 = vpop.f32.mrf.mxu1  ;;  %v161_v1 = vpop.f32.mrf.mxu0 }
  0xd6   :  { %v193_v4 = vpop.f32.mrf.mxu1  ;;  %v2079_v5 = vpop.f32.mrf.mxu0 }
  0xd8   :  { %v2087_v32 = vpop.f32.mrf.mxu1  ;;  %v164_v17 = vpop.f32.mrf.mxu0 }
  0xda   :  { %v3018_v23 = vpop.f32.mrf.mxu1  ;;  %v2114_v34 = vpop.f32.mrf.mxu0 }
  0xdc   :  { %v2094_v30 = vpop.f32.mrf.mxu1  ;;  %v440_v36 = vpop.f32.mrf.mxu0 }
  0xdd   :  { %v287_v35 = vadd.f32 %v2094_v30, %v2074_v21 }
  0xde   :  { %v278_v51 = vpop.f32.mrf.mxu1  ;;  %v2115_v61 = vpop.f32.mrf.mxu0 }
  0xdf   :  { %v3020_v40 = vadd.f32 %v2114_v34, %v287_v35  ;;  %v279_v41 = vadd.f32 %v278_v51, %v145_v46 }
  0xe0   :  { %v2095_v33 = vpop.f32.mrf.mxu1  ;;  %v443_v57 = vpop.f32.mrf.mxu0 }
  0xe1   :  { %v3022_v62 = vadd.f32 %v440_v36, %v279_v41  ;;  %v290_v52 = vadd.f32 %v2095_v33, %v2075_v48 }
  0xe2   :  { %v281_v54 = vpop.f32.mrf.mxu1  ;;  %v2118_v29 = vpop.f32.mrf.mxu0 }
  0xe3   :  { %v3024_v13 = vadd.f32 %v2115_v61, %v290_v52  ;;  %v282_v39 = vadd.f32 %v281_v54, %v148_v50 }
  0xe4   :  { %v2098_v60 = vpop.f32.mrf.mxu1  ;;  %v456_v16 = vpop.f32.mrf.mxu0 }
  0xe5   :  { %v3026_v0 = vadd.f32 %v443_v57, %v282_v39  ;;  %v303_v9 = vadd.f32 %v2098_v60, %v2078_v56 }
  0xe6   :  { %v294_v26 = vpop.f32.mrf.mxu1  ;;  %v2119_v53 = vpop.f32.mrf.mxu0 }
  0xe7   :  { %v3028_v24 = vadd.f32 %v2118_v29, %v303_v9  ;;  %v295_v43 = vadd.f32 %v294_v26, %v161_v1 }
  0xe8   :  { %v2099_v14 = vpop.f32.mrf.mxu1  ;;  %v459_v44 = vpop.f32.mrf.mxu0 }
  0xe9   :  { %v3030_v58 = vadd.f32 %v456_v16, %v295_v43  ;;  %v306_v31 = vadd.f32 %v2099_v14, %v2079_v5 }
  0xea   :  { %v297_v15 = vpop.f32.mrf.mxu1  ;;  %v2122_v3 = vpop.f32.mrf.mxu0 }
  0xeb   :  { %v3032_v45 = vadd.f32 %v2119_v53, %v306_v31  ;;  %v298_v59 = vadd.f32 %v297_v15, %v164_v17 }
  0xec   :  { %v2102_v2 = vpop.f32.mrf.mxu1  ;;  %v472_v18 = vpop.f32.mrf.mxu0 }
  0xed   :  { %v3034_v7 = vadd.f32 %v459_v44, %v298_v59  ;;  %v319_v8 = vadd.f32 %v2102_v2, %v2082_v28 }
  0xee   :  { %v310_v12 = vpop.f32.mrf.mxu1  ;;  %v2123_v37 = vpop.f32.mrf.mxu0 }
  0xef   :  { %v3036_v22 = vadd.f32 %v2122_v3, %v319_v8  ;;  %v311_v19 = vadd.f32 %v310_v12, %v177_v47 }
  0xf0   :  { %v2103_v25 = vpop.f32.mrf.mxu1  ;;  %v475_v11 = vpop.f32.mrf.mxu0 }
  0xf1   :  { %v3038_v27 = vadd.f32 %v472_v18, %v311_v19  ;;  %v322_v6 = vadd.f32 %v2103_v25, %v2083_v49 }
  0xf2   :  { %v313_v10 = vpop.f32.mrf.mxu1  ;;  %v2126_v21 = vpop.f32.mrf.mxu0 }
  0xf3   :  { %v3040_v20 = vadd.f32 %v2123_v37, %v322_v6  ;;  %v314_v38 = vadd.f32 %v313_v10, %v180_v55 }
  0xf4   :  { %v2106_v42 = vpop.f32.mrf.mxu1  ;;  %v488_v50 = vpop.f32.mrf.mxu0 }
  0xf5   :  { %v3042_v46 = vadd.f32 %v475_v11, %v314_v38  ;;  %v335_v28 = vadd.f32 %v2106_v42, %v2086_v63 }
  0xf6   :  { %v326_v48 = vpop.f32.mrf.mxu1  ;;  %v2127_v5 = vpop.f32.mrf.mxu0 }
  0xf7   :  { %v3044_v56 = vadd.f32 %v2126_v21, %v335_v28  ;;  %v327_v47 = vadd.f32 %v326_v48, %v193_v4 }
  0xf8   :  { %v2107_v1 = vpop.f32.mrf.mxu1  ;;  %v491_v34 = vpop.f32.mrf.mxu0 }
  0xf9   :  { %v3046_v17 = vadd.f32 %v488_v50, %v327_v47  ;;  %v338_v49 = vadd.f32 %v2107_v1, %v2087_v32 }
  0xfa   :  { %v329_v30 = vpop.f32.mrf.mxu1  ;;  %v2154_v36 = vpop.f32.mrf.mxu0 }
  0xfb   :  { %v3048_v35 = vadd.f32 %v2127_v5, %v338_v49  ;;  %v330_v55 = vadd.f32 %v329_v30, %v3018_v23 }
  0xfc   :  { %v2134_v51 = vpop.f32.mrf.mxu1  ;;  %v798_v33 = vpop.f32.mrf.mxu0 }
  0xfd   :  { %v3051_v41 = vadd.f32 %v491_v34, %v330_v55 }
  0xfe   :  { %v619_v63 = vpop.f32.mrf.mxu1  ;;  %v3053_v52 = vpop.f32.mrf.mxu0 }
 0x100   :  { %v2135_v61 = vpop.f32.mrf.mxu1  ;;  %v3055_v54 = vpop.f32.mrf.mxu0 }
 0x102   :  { %v622_v4 = vpop.f32.mrf.mxu1  ;;  %v3057_v32 = vpop.f32.mrf.mxu0 }
 0x104   :  { %v2138_v57 = vpop.f32.mrf.mxu1  ;;  %v3059_v60 = vpop.f32.mrf.mxu0 }
 0x106   :  { %v635_v39 = vpop.f32.mrf.mxu1  ;;  %v3061_v23 = vpop.f32.mrf.mxu0 }
 0x108   :  { %v2139_v29 = vpop.f32.mrf.mxu1  ;;  %v3063_v26 = vpop.f32.mrf.mxu0 }
 0x10a   :  { %v638_v9 = vpop.f32.mrf.mxu1  ;;  %v3065_v43 = vpop.f32.mrf.mxu0 }
 0x10c   :  { %v2142_v16 = vpop.f32.mrf.mxu1  ;;  %v3067_v53 = vpop.f32.mrf.mxu0 }
 0x10e   :  { %v651_v14 = vpop.f32.mrf.mxu1  ;;  %v3069_v15 = vpop.f32.mrf.mxu0 }
 0x110   :  { %v2143_v31 = vpop.f32.mrf.mxu1  ;;  %v3071_v59 = vpop.f32.mrf.mxu0 }
 0x112   :  { %v654_v44 = vpop.f32.mrf.mxu1  ;;  %v3075_v3 = vpop.f32.mrf.mxu0 }
 0x113   :  { %3323 = vst [vmem:[#allocation5_spill] sm:$0xff] %v3075_v3 }
 0x114   :  { %v3073_v2 = vpop.f32.mrf.mxu1  ;;  %v3079_v12 = vpop.f32.mrf.mxu0 }
 0x115   :  { %3324 = vst [vmem:[#allocation6_spill] sm:$0xff] %v3079_v12 }
 0x116   :  { %v3077_v8 = vpop.f32.mrf.mxu1  ;;  %v3083_v19 = vpop.f32.mrf.mxu0 }
 0x117   :  { %3325 = vst [vmem:[#allocation7_spill] sm:$0xff] %v3083_v19 }
 0x118   :  { %v3081_v18 = vpop.f32.mrf.mxu1  ;;  %v3087_v37 = vpop.f32.mrf.mxu0 }
 0x119   :  { %3326 = vst [vmem:[#allocation8_spill] sm:$0xff] %v3087_v37 }
 0x11a   :  { %v3085_v25 = vpop.f32.mrf.mxu1  ;;  %v2194_v10 = vpop.f32.mrf.mxu0 }
 0x11c   :  { %v2174_v6 = vpop.f32.mrf.mxu1  ;;  %v1155_v38 = vpop.f32.mrf.mxu0 }
 0x11e   :  { %v976_v11 = vpop.f32.mrf.mxu1  ;;  %v3089_v21 = vpop.f32.mrf.mxu0 }
 0x120   :  { %v2175_v42 = vpop.f32.mrf.mxu1  ;;  %v3091_v48 = vpop.f32.mrf.mxu0 }
 0x121   :  { %3327 = vst [vmem:[#allocation9_spill] sm:$0xff] %v3091_v48 }
 0x122   :  { %v979_v28 = vpop.f32.mrf.mxu1  ;;  %v3095_v47 = vpop.f32.mrf.mxu0 }
 0x123   :  { %3328 = vst [vmem:[#allocation10_spill] sm:$0xff] %v3095_v47 }
 0x124   :  { %v3093_v50 = vpop.f32.mrf.mxu1  ;;  %v3099_v5 = vpop.f32.mrf.mxu0 }
 0x125   :  { %3329 = vst [vmem:[#allocation11_spill] sm:$0xff] %v3099_v5  ;;  %v684_v5 = vadd.f32 %v2134_v51, %v3020_v40  ;;  %v683_v40 = vadd.f32 %v622_v4, %v3026_v0  ;;  %v690_v0 = vadd.f32 %v651_v14, %v3038_v27  ;;  %v693_v4 = vadd.f32 %v2143_v31, %v3040_v20 }
 0x126   :  { %v3097_v1 = vpop.f32.mrf.mxu1  ;;  %v3103_v30 = vpop.f32.mrf.mxu0 }
 0x127   :  { %3331 = vst [vmem:[#allocation13_spill] sm:$0xff] %v3103_v30 }
 0x128   :  { %v3101_v49 = vpop.f32.mrf.mxu1  ;;  %v3107_v55 = vpop.f32.mrf.mxu0 }
 0x129   :  { %3330 = vst [vmem:[#allocation12_spill] sm:$0xff] %v3101_v49  ;;  %3333 = vst [vmem:[#allocation15_spill] sm:$0xff] %v3107_v55  ;;  %v682_v55 = vadd.f32 %v619_v63, %v3022_v62  ;;  %v689_v62 = vadd.f32 %v2139_v29, %v3032_v45  ;;  %v687_v63 = vadd.f32 %v638_v9, %v3034_v7 }
 0x12a   :  { %v3105_v34 = vpop.f32.mrf.mxu1  ;;  %v3111_v19 = vpop.f32.mrf.mxu0  ;;  %v862_v45 = vadd.f32 %v3055_v54, %v683_v40  ;;  %v691_v7 = vadd.f32 %v654_v44, %v3042_v46  ;;  %v869_v54 = vadd.f32 %v3067_v53, %v690_v0  ;;  %v872_v46 = vadd.f32 %v3069_v15, %v693_v4 }
 0x12b   :  { %3332 = vst [vmem:[#allocation14_spill] sm:$0xff] %v3105_v34  ;;  %3335 = vst [vmem:[#allocation17_spill] sm:$0xff] %v3111_v19  ;;  %v863_v19 = vadd.f32 %v2154_v36, %v684_v5  ;;  %v866_v27 = vadd.f32 %v3063_v26, %v687_v63  ;;  %v697_v15 = vadd.f32 %v3081_v18, %v3048_v35  ;;  %v3345_v5 = vld [vmem:[#allocation6_spill] sm:$0xff] }
 0x12c   :  { %v3109_v37 = vpop.f32.mrf.mxu1  ;;  %v3115_v3 = vpop.f32.mrf.mxu0  ;;  %v1040_v31 = vadd.f32 %v979_v28, %v862_v45  ;;  %v870_v44 = vadd.f32 %v3071_v59, %v691_v7  ;;  %v3344_v28 = vld [vmem:[#allocation5_spill] sm:$0xff]  ;;  %v3351_v4 = vld [vmem:[#allocation11_spill] sm:$0xff] }
 0x12d   :  { %3334 = vst [vmem:[#allocation16_spill] sm:$0xff] %v3109_v37  ;;  %3337 = vst [vmem:[#allocation19_spill] sm:$0xff] %v3115_v3  ;;  %v1041_v51 = vadd.f32 %v2174_v6, %v863_v19 }
 0x12e   :  { %v3113_v12 = vpop.f32.mrf.mxu1  ;;  %v3119_v48 = vpop.f32.mrf.mxu0 }
 0x12f   :  { %3336 = vst [vmem:[#allocation18_spill] sm:$0xff] %v3113_v12  ;;  %3339 = vst [vmem:[#allocation21_spill] sm:$0xff] %v3119_v48  ;;  %v685_v12 = vadd.f32 %v2135_v61, %v3024_v13  ;;  %v861_v48 = vadd.f32 %v798_v33, %v682_v55  ;;  %v692_v61 = vadd.f32 %v2142_v16, %v3036_v22 }
 0x130   :  { %v3117_v47 = vpop.f32.mrf.mxu1  ;;  %v3124_v30 = vpop.f32.mrf.mxu0  ;;  %v868_v22 = vadd.f32 %v3061_v23, %v689_v62  ;;  %v3169_v23 = vld [vmem:[%s3313_s2] ss:$0 sm:$0xff]  ;;  %v3346_v18 = vld [vmem:[#allocation12_spill] sm:$0xff]  ;;  %v3348_v62 = vld [vmem:[#allocation7_spill] sm:$0xff]  ;;  %s2359_s2 = smov [#allocation2]  }
 0x131   :  { %3338 = vst [vmem:[#allocation20_spill] sm:$0xff] %v3117_v47  ;;  %3341 = vst [vmem:[#allocation23_spill] sm:$0xff] %v3124_v30  ;;  %v686_v30 = vadd.f32 %v635_v39, %v3030_v58  ;;  %v864_v13 = vadd.f32 %v3053_v52, %v685_v12  ;;  %v1039_v33 = vadd.f32 %v976_v11, %v861_v48  ;;  %v3343_v11 = vld [vmem:[#allocation9_spill] sm:$0xff]  ;;  %s1732_s9 = sshll.u32 %s2359_s2, 4  ;;  %s1733_s9 = int_to_ptr.vmem [resolvable:$true] %s1732_s9 }
 0x132   :  { %v3122_v49 = vpop.f32.mrf.mxu1  ;;  %v3129_v37 = vpop.f32.mrf.mxu0  ;;  %v871_v16 = vadd.f32 %v3065_v43, %v692_v61  ;;  %v876_v63 = vadd.f32 %v3348_v62, %v697_v15  ;;  %s2337_s1 = scalar_lea.vmem %s1733_s9, 2048  ;;  %p2342_p1 = scmp.lt.s32.totalorder %s1733_s9, %s1733_s9 }
 0x133   :  { %3340 = vst [vmem:[#allocation22_spill] sm:$0xff] %v3122_v49  ;;  %3342 = vst [vmem:[#allocation24_spill] sm:$0xff] %v3129_v37  ;;  %v688_v49 = vadd.f32 %v2138_v57, %v3028_v24  ;;  %v1220_v57 = vadd.f32 %v2194_v10, %v1041_v51  ;;  %v1042_v39 = vadd.f32 %v2175_v42, %v864_v13  ;;  %v3349_v13 = vld [vmem:[#allocation8_spill] sm:$0xff]  ;;  %p2338_p0 = scmp.ne.s32.totalorder %s1733_s9, %s2337_s1  ;;  %p2343_p2 = scmp.lt.s32.totalorder %s2337_s1, %s2337_s1 }
 0x134   :  { %v3127_v34 = vpop.f32.mrf.mxu1  ;;  %v3134_v47 = vpop.f32.mrf.mxu0  ;;  %v865_v52 = vadd.f32 %v3059_v60, %v686_v30  ;;  %v1218_v14 = vadd.f32 %v1155_v38, %v1039_v33  ;;  %v694_v60 = vadd.f32 %v3077_v8, %v3046_v17  ;;  %v1219_v38 = vadd.f32 %v3343_v11, %v1040_v31  ;;  %v3350_v33 = vld [vmem:[#allocation10_spill] sm:$0xff]  ;;  %v3354_v31 = vld [vmem:[#allocation16_spill] sm:$0xff] }
 0x135   :  { %v867_v29 = vadd.f32 %v3057_v32, %v688_v49  ;;  %v696_v32 = vadd.f32 %v3073_v2, %v3044_v56  ;;  %v1221_v19 = vadd.f32 %v3089_v21, %v1042_v39  ;;  %v695_v56 = vadd.f32 %v3085_v25, %v3051_v41  ;;  %v3347_v25 = vld [vmem:[#allocation14_spill] sm:$0xff]  ;;  %p2344_p3 = por %p2343_p2, %p2342_p1 }
 0x136   :  { %v3132_v3 = vpop.f32.mrf.mxu1  ;;  %v3143_v36 = vpop.f32.mrf.mxu0  ;;  %v1043_v2 = vadd.f32 %v3097_v1, %v865_v52  ;;  %v3185_v35 = vadd.f32 %v3345_v5, %v694_v60  ;;  %v1046_v41 = vadd.f32 %v3346_v18, %v868_v22 }
 0x137   :  { %v1045_v17 = vadd.f32 %v3093_v50, %v867_v29  ;;  %v875_v48 = vadd.f32 %v3344_v28, %v696_v32  ;;  %v1044_v50 = vadd.f32 %v3347_v25, %v866_v27  ;;  %v3195_v61 = vadd.f32 %v3349_v13, %v695_v56  ;;  %v3352_v27 = vld [vmem:[#allocation13_spill] sm:$0xff]  ;;  %p2345_p4 = pnand %p2344_p3, %p2338_p0 }
 0x138   :  { %v3141_v37 = vpop.f32.mrf.mxu1  ;;  %v3151_v58 = vpop.f32.mrf.mxu0  ;;  %v1222_v45 = vadd.f32 %v3351_v4, %v1043_v2  ;;  %v3356_v56 = vld [vmem:[#allocation20_spill] sm:$0xff] }
 0x139   :  { %v1224_v0 = vadd.f32 %v3350_v33, %v1045_v17  ;;  %v1050_v17 = vadd.f32 %v3356_v56, %v872_v46 }
 0x13a   :  { %v3149_v24 = vpop.f32.mrf.mxu1  ;;  %v2234_v20 = vpop.f32.mrf.mxu0  ;;  %v3358_v5 = vld [vmem:[#allocation22_spill] sm:$0xff] }
 0x13b   :  { %v1048_v18 = vadd.f32 %v3358_v5, %v870_v44 }
 0x13c   :  { %v2214_v9 = vpop.f32.mrf.mxu1  ;;  %v1512_v43 = vpop.f32.mrf.mxu0 }
 0x13d   :  { %v1399_v12 = vadd.f32 %v2214_v9, %v1220_v57  ;;  %v1225_v9 = vadd.f32 %v3352_v27, %v1046_v41 }
 0x13e   :  { %v1334_v26 = vpop.f32.mrf.mxu1  ;;  %v2235_v10 = vpop.f32.mrf.mxu0 }
 0x13f   :  { %v1577_v53 = vadd.f32 %v2234_v20, %v1399_v12  ;;  %v1397_v6 = vadd.f32 %v1334_v26, %v1218_v14  ;;  %v3353_v20 = vld [vmem:[#allocation15_spill] sm:$0xff]  ;;  %v1049_v12 = vadd.f32 %v3354_v31, %v871_v16 }
 0x140   :  { %v2215_v8 = vpop.f32.mrf.mxu1  ;;  %v1515_v1 = vpop.f32.mrf.mxu0  ;;  %v1223_v14 = vadd.f32 %v3353_v20, %v1044_v50 }
 0x141   :  { %v3181_v59 = vadd.f32 %v3169_v23, %v1577_v53  ;;  %v1575_v42 = vadd.f32 %v1512_v43, %v1397_v6  ;;  %v1400_v21 = vadd.f32 %v2215_v8, %v1221_v19  ;;  %v3355_v6 = vld [vmem:[#allocation18_spill] sm:$0xff] }
 0x142   :  { %v1337_v49 = vpop.f32.mrf.mxu1  ;;  %v2238_v57 = vpop.f32.mrf.mxu0  ;;  %v1047_v15 = vadd.f32 %v3355_v6, %v869_v54 }
 0x143   :  { %v1616_v30 = vsub.f32 0.0, %v3181_v59  ;;  %v3191_v55 = vadd.f32 %v3169_v23, %v1575_v42  ;;  %v1578_v40 = vadd.f32 %v2235_v10, %v1400_v21  ;;  %v1398_v51 = vadd.f32 %v1337_v49, %v1219_v38  ;;  %v3357_v21 = vld [vmem:[#allocation17_spill] sm:$0xff] }
 0x144   :  { %v2218_v7 = vpop.f32.mrf.mxu1  ;;  %v1528_v26 = vpop.f32.mrf.mxu0  ;;  %v1228_v28 = vadd.f32 %v3357_v21, %v1049_v12 }
 0x145   :  { %v1634_v39 = vmul.f32 1.442695, %v1616_v30  ;;  %v1614_v29 = vsub.f32 0.0, %v3191_v55  ;;  %v3201_v52 = vadd.f32 %v3169_v23, %v1578_v40  ;;  %v1576_v22 = vadd.f32 %v1515_v1, %v1398_v51  ;;  %v3359_v30 = vld [vmem:[#allocation19_spill] sm:$0xff]  ;;  %v3360_v51 = vld [vmem:[#allocation21_spill] sm:$0xff] }
 0x146   :  { %v1403_v32 = vadd.f32 %v2218_v7, %v1224_v0  ;;  %v1350_v60 = vpop.f32.mrf.mxu1  ;;  %v2239_v11 = vpop.f32.mrf.mxu0  ;;  %v1226_v40 = vadd.f32 %v3359_v30, %v1047_v15  ;;  %v1229_v62 = vadd.f32 %v3360_v51, %v1050_v17  ;;  %v3362_v17 = vld [vmem:[#allocation24_spill] sm:$0xff] }
 0x147   :  { %2273 = vpow2.f32 %v1634_v39  ;;  %v1630_v43 = vmul.f32 1.442695, %v1614_v29  ;;  %v1617_v19 = vsub.f32 0.0, %v3201_v52  ;;  %v3208_v53 = vadd.f32 %v3169_v23, %v1576_v22 }
 0x148   :  { %v1581_v2 = vadd.f32 %v2238_v57, %v1403_v32  ;;  %v1401_v8 = vadd.f32 %v1350_v60, %v1222_v45  ;;  %v2219_v10 = vpop.f32.mrf.mxu1  ;;  %v1531_v50 = vpop.f32.mrf.mxu0  ;;  %v3361_v57 = vld [vmem:[#allocation23_spill] sm:$0xff]  ;;  %v1053_v29 = vadd.f32 %v3127_v34, %v875_v48  ;;  %v1051_v60 = vadd.f32 %v3132_v3, %v3185_v35 }
 0x149   :  { %2275 = vpow2.f32 %v1630_v43  ;;  %v1636_v16 = vmul.f32 1.442695, %v1617_v19  ;;  %v1615_v38 = vsub.f32 0.0, %v3208_v53  ;;  %v1404_v42 = vadd.f32 %v2219_v10, %v1225_v9 }
 0x14a   :  { %v3216_v41 = vadd.f32 %v3169_v23, %v1581_v2  ;;  %v1579_v25 = vadd.f32 %v1528_v26, %v1401_v8  ;;  %v1353_v54 = vpop.f32.mrf.mxu1  ;;  %v2242_v0 = vpop.f32.mrf.mxu0  ;;  %v1227_v39 = vadd.f32 %v3361_v57, %v1048_v18  ;;  %v1054_v26 = vadd.f32 %v3141_v37, %v876_v63 }
 0x14b   :  { %2277 = vpow2.f32 %v1636_v16  ;;  %v1632_v46 = vmul.f32 1.442695, %v1615_v38  ;;  %v1582_v49 = vadd.f32 %v2239_v11, %v1404_v42  ;;  %v1402_v1 = vadd.f32 %v1353_v54, %v1223_v14 }
 0x14c   :  { %v1620_v13 = vsub.f32 0.0, %v3216_v41  ;;  %v3222_v33 = vadd.f32 %v3169_v23, %v1579_v25  ;;  %v2222_v44 = vpop.f32.mrf.mxu1  ;;  %v1544_v20 = vpop.f32.mrf.mxu0  ;;  %v1232_v2 = vadd.f32 %v3362_v17, %v1053_v29  ;;  %v1052_v8 = vadd.f32 %v3149_v24, %v3195_v61 }
 0x14d   :  { %2279 = vpow2.f32 %v1632_v46  ;;  %v3225_v4 = vadd.f32 %v3169_v23, %v1582_v49  ;;  %v1580_v45 = vadd.f32 %v1531_v50, %v1402_v1  ;;  %v1407_v7 = vadd.f32 %v2222_v44, %v1228_v28 }
 0x14e   :  { %v1642_v22 = vmul.f32 1.442695, %v1620_v13  ;;  %v1618_v27 = vsub.f32 0.0, %v3222_v33  ;;  %v1366_v9 = vpop.f32.mrf.mxu1  ;;  %v2243_v48 = vpop.f32.mrf.mxu0  ;;  %v1230_v38 = vadd.f32 %v3134_v47, %v1051_v60  ;;  %v1233_v42 = vadd.f32 %v3143_v36, %v1054_v26 }
 0x14f   :  { %v1621_v14 = vsub.f32 0.0, %v3225_v4  ;;  %v3232_v31 = vadd.f32 %v3169_v23, %v1580_v45  ;;  %v1585_v12 = vadd.f32 %v2242_v0, %v1407_v7  ;;  %v1405_v32 = vadd.f32 %v1366_v9, %v1226_v40 }
 0x150   :  { %2281 = vpow2.f32 %v1642_v22  ;;  %v1638_v43 = vmul.f32 1.442695, %v1618_v27  ;;  %v2223_v34 = vpop.f32.mrf.mxu1  ;;  %v1547_v37 = vpop.f32.mrf.mxu0  ;;  %v1231_v50 = vadd.f32 %v3151_v58, %v1052_v8 }
 0x151   :  { %v1644_v19 = vmul.f32 1.442695, %v1621_v14  ;;  %v1619_v6 = vsub.f32 0.0, %v3232_v31  ;;  %v3239_v15 = vadd.f32 %v3169_v23, %v1585_v12  ;;  %v1583_v56 = vadd.f32 %v1544_v20, %v1405_v32 }
 0x152   :  { %2283 = vpow2.f32 %v1638_v43  ;;  %v1408_v3 = vadd.f32 %v2223_v34, %v1229_v62  ;;  %v1369_v35 = vpop.f32.mrf.mxu1  ;;  %v2246_v24 = vpop.f32.mrf.mxu0 }
 0x153   :  { %2285 = vpow2.f32 %v1644_v19  ;;  %v1640_v63 = vmul.f32 1.442695, %v1619_v6  ;;  %v1624_v10 = vsub.f32 0.0, %v3239_v15  ;;  %v3246_v11 = vadd.f32 %v3169_v23, %v1583_v56 }
 0x154   :  { %v2274_v16 = vpop.eup %2273  ;;  %v1586_v21 = vadd.f32 %v2243_v48, %v1408_v3  ;;  %v1406_v28 = vadd.f32 %v1369_v35, %v1227_v39  ;;  %v2226_v5 = vpop.f32.mrf.mxu1 }
 0x155   :  { %v1664_v61 = vadd.f32 1.0, %v2274_v16  ;;  %2287 = vpow2.f32 %v1640_v63  ;;  %v1650_v18 = vmul.f32 1.442695, %v1624_v10  ;;  %v1622_v25 = vsub.f32 0.0, %v3246_v11  ;;  %v1560_v30 = vpop.f32.mrf.mxu0 }
 0x156   :  { %v2276_v54 = vpop.eup %2275  ;;  %v3253_v46 = vadd.f32 %v3169_v23, %v1586_v21  ;;  %v1584_v49 = vadd.f32 %v1547_v37, %v1406_v28  ;;  %v1411_v1 = vadd.f32 %v2226_v5, %v1232_v2  ;;  %v1382_v47 = vpop.f32.mrf.mxu1 }
 0x157   :  { %2289 = vrcp.f32 %v1664_v61  ;;  %v1662_v36 = vadd.f32 1.0, %v2276_v54  ;;  %v1646_v40 = vmul.f32 1.442695, %v1622_v25  ;;  %v1409_v51 = vadd.f32 %v1382_v47, %v1230_v38  ;;  %v2247_v39 = vpop.f32.mrf.mxu0 }
 0x158   :  { %v2278_v62 = vpop.eup %2277  ;;  %2291 = vpow2.f32 %v1650_v18  ;;  %v1625_v13 = vsub.f32 0.0, %v3253_v46  ;;  %v3257_v44 = vadd.f32 %v3169_v23, %v1584_v49  ;;  %v1589_v0 = vadd.f32 %v2246_v24, %v1411_v1  ;;  %v2227_v58 = vpop.f32.mrf.mxu1 }
 0x159   :  { %2293 = vrcp.f32 %v1662_v36  ;;  %v1665_v45 = vadd.f32 1.0, %v2278_v62  ;;  %v1587_v7 = vadd.f32 %v1560_v30, %v1409_v51  ;;  %v1412_v57 = vadd.f32 %v2227_v58, %v1233_v42  ;;  %v1563_v6 = vpop.f32.mrf.mxu0 }
 0x15a   :  { %v2280_v29 = vpop.eup %2279  ;;  %2295 = vpow2.f32 %v1646_v40  ;;  %v1652_v22 = vmul.f32 1.442695, %v1625_v13  ;;  %v1623_v27 = vsub.f32 0.0, %v3257_v44  ;;  %v3261_v9 = vadd.f32 %v3169_v23, %v1589_v0  ;;  %v1385_v20 = vpop.f32.mrf.mxu1 }
 0x15b   :  { %2297 = vrcp.f32 %v1665_v45  ;;  %v1663_v14 = vadd.f32 1.0, %v2280_v29  ;;  %v3264_v12 = vadd.f32 %v3169_v23, %v1587_v7  ;;  %v1590_v32 = vadd.f32 %v2247_v39, %v1412_v57 }
 0x15c   :  { %2299 = vpow2.f32 %v1652_v22  ;;  %v1648_v60 = vmul.f32 1.442695, %v1623_v27  ;;  %v1628_v26 = vsub.f32 0.0, %v3261_v9  ;;  %v1410_v43 = vadd.f32 %v1385_v20, %v1231_v50 }
 0x15d   :  { %v2282_v34 = vpop.eup %2281  ;;  %2301 = vrcp.f32 %v1663_v14  ;;  %v1626_v48 = vsub.f32 0.0, %v3264_v12  ;;  %v3269_v19 = vadd.f32 %v3169_v23, %v1590_v32 }
 0x15e   :  { %v1668_v56 = vadd.f32 1.0, %v2282_v34  ;;  %2303 = vpow2.f32 %v1648_v60  ;;  %v1658_v17 = vmul.f32 1.442695, %v1628_v26  ;;  %v1588_v2 = vadd.f32 %v1563_v6, %v1410_v43 }
 0x15f   :  { %v2284_v8 = vpop.eup %2283  ;;  %v1629_v3 = vsub.f32 0.0, %v3269_v19  ;;  %v1654_v63 = vmul.f32 1.442695, %v1626_v48 }
 0x160   :  { %v2286_v35 = vpop.eup %2285  ;;  %2305 = vrcp.f32 %v1668_v56  ;;  %v1666_v37 = vadd.f32 1.0, %v2284_v8  ;;  %v3273_v10 = vadd.f32 %v3169_v23, %v1588_v2 }
 0x161   :  { %v1669_v16 = vadd.f32 1.0, %v2286_v35  ;;  %2307 = vpow2.f32 %v1658_v17  ;;  %v1660_v42 = vmul.f32 1.442695, %v1629_v3 }
 0x162   :  { %v2288_v38 = vpop.eup %2287  ;;  %2309 = vrcp.f32 %v1666_v37  ;;  %v1627_v21 = vsub.f32 0.0, %v3273_v10 }
 0x163   :  { %2311 = vrcp.f32 %v1669_v16  ;;  %v1667_v28 = vadd.f32 1.0, %v2288_v38 }
 0x164   :  { %v2290_v5 = vpop.eup %2289  ;;  %2313 = vpow2.f32 %v1654_v63  ;;  %v1656_v24 = vmul.f32 1.442695, %v1627_v21 }
 0x165   :  { %v2292_v61 = vpop.eup %2291  ;;  %v1696_v18 = vmul.f32 %v2290_v5, %v3181_v59  ;;  %2315 = vrcp.f32 %v1667_v28 }
 0x166   :  { %v2294_v25 = vpop.eup %2293  ;;  %v1672_v23 = vadd.f32 1.0, %v2292_v61  ;;  %2317 = vpow2.f32 %v1660_v42 }
 0x167   :  { %v2296_v54 = vpop.eup %2295  ;;  %1713 = vst.msk [vmem:[#allocation2 + $0x10] sm:$0xff] %vm1710_vm1, %v1696_v18  ;;  %v1694_v50 = vmul.f32 %v2294_v25, %v3191_v55  ;;  %2319 = vpow2.f32 %v1656_v24 }
 0x168   :  { %v2298_v49 = vpop.eup %2297  ;;  %2321 = vrcp.f32 %v1672_v23  ;;  %v1670_v1 = vadd.f32 1.0, %v2296_v54 }
 0x169   :  { %v2300_v47 = vpop.eup %2299  ;;  %1711 = vst.msk [vmem:[#allocation2] sm:$0xff] %vm1710_vm1, %v1694_v50  ;;  %v1697_v30 = vmul.f32 %v2298_v49, %v3201_v52 }
 0x16a   :  { %v2302_v36 = vpop.eup %2301  ;;  %2323 = vrcp.f32 %v1670_v1  ;;  %v1673_v59 = vadd.f32 1.0, %v2300_v47 }
 0x16b   :  { %v2304_v40 = vpop.eup %2303  ;;  %1714 = vst.msk [vmem:[#allocation2 + $0x18] sm:$0xff] %vm1710_vm1, %v1697_v30  ;;  %v1695_v51 = vmul.f32 %v2302_v36, %v3208_v53 }
 0x16c   :  { %2325 = vrcp.f32 %v1673_v59  ;;  %v1671_v62 = vadd.f32 1.0, %v2304_v40 }
 0x16d   :  { %v2306_v55 = vpop.eup %2305  ;;  %1712 = vst.msk [vmem:[#allocation2 + $0x8] sm:$0xff] %vm1710_vm1, %v1695_v51 }
 0x16e   :  { %v2308_v13 = vpop.eup %2307  ;;  %v1700_v0 = vmul.f32 %v2306_v55, %v3216_v41  ;;  %2327 = vrcp.f32 %v1671_v62 }
 0x16f   :  { %v2310_v58 = vpop.eup %2309  ;;  %v1676_v45 = vadd.f32 1.0, %v2308_v13 }
 0x170   :  { %v2312_v52 = vpop.eup %2311  ;;  %1717 = vst.msk [vmem:[#allocation2 + $0x30] sm:$0xff] %vm1710_vm1, %v1700_v0  ;;  %v1698_v7 = vmul.f32 %v2310_v58, %v3222_v33 }
 0x171   :  { %v2314_v57 = vpop.eup %2313  ;;  %v1701_v39 = vmul.f32 %v2312_v52, %v3225_v4  ;;  %2329 = vrcp.f32 %v1676_v45 }
 0x172   :  { %v2316_v53 = vpop.eup %2315  ;;  %1715 = vst.msk [vmem:[#allocation2 + $0x20] sm:$0xff] %vm1710_vm1, %v1698_v7  ;;  %v1674_v29 = vadd.f32 1.0, %v2314_v57 }
 0x173   :  { %v2318_v22 = vpop.eup %2317  ;;  %1718 = vst.msk [vmem:[#allocation2 + $0x38] sm:$0xff] %vm1710_vm1, %v1701_v39  ;;  %v1699_v41 = vmul.f32 %v2316_v53, %v3232_v31 }
 0x174   :  { %v2320_v27 = vpop.eup %2319  ;;  %2331 = vrcp.f32 %v1674_v29  ;;  %v1677_v20 = vadd.f32 1.0, %v2318_v22 }
 0x175   :  { %v2322_v14 = vpop.eup %2321  ;;  %1716 = vst.msk [vmem:[#allocation2 + $0x28] sm:$0xff] %vm1710_vm1, %v1699_v41  ;;  %v1675_v33 = vadd.f32 1.0, %v2320_v27 }
 0x176   :  { %v1704_v32 = vmul.f32 %v2322_v14, %v3239_v15  ;;  %2333 = vrcp.f32 %v1677_v20 }
 0x177   :  { %v2324_v4 = vpop.eup %2323  ;;  %2335 = vrcp.f32 %v1675_v33 }
 0x178   :  { %1721 = vst.msk [vmem:[#allocation2 + $0x50] sm:$0xff] %vm1710_vm1, %v1704_v32  ;;  %v1702_v60 = vmul.f32 %v2324_v4, %v3246_v11 }
 0x179   :  { %v2326_v26 = vpop.eup %2325 }
 0x17a   :  { %1719 = vst.msk [vmem:[#allocation2 + $0x40] sm:$0xff] %vm1710_vm1, %v1702_v60  ;;  %v1705_v31 = vmul.f32 %v2326_v26, %v3253_v46 }
 0x17b   :  { %v2328_v43 = vpop.eup %2327 }
 0x17c   :  { %1722 = vst.msk [vmem:[#allocation2 + $0x58] sm:$0xff] %vm1710_vm1, %v1705_v31  ;;  %v1703_v34 = vmul.f32 %v2328_v43, %v3257_v44 }
 0x17e   :  { %v2330_v48 = vpop.eup %2329  ;;  %1720 = vst.msk [vmem:[#allocation2 + $0x48] sm:$0xff] %vm1710_vm1, %v1703_v34 }
 0x17f   :  { %v1708_v15 = vmul.f32 %v2330_v48, %v3261_v9 }
 0x181   :  { %v2332_v6 = vpop.eup %2331  ;;  %1725 = vst.msk [vmem:[#allocation2 + $0x70] sm:$0xff] %vm1710_vm1, %v1708_v15 }
 0x182   :  { %v1706_v11 = vmul.f32 %v2332_v6, %v3264_v12 }
 0x183   :  { %v2334_v56 = vpop.eup %2333 }
 0x184   :  { %v2336_v17 = vpop.eup %2335  ;;  %1723 = vst.msk [vmem:[#allocation2 + $0x60] sm:$0xff] %vm1710_vm1, %v1706_v11  ;;  %v1709_v46 = vmul.f32 %v2334_v56, %v3269_v19 }
 0x185   :  { %v1707_v44 = vmul.f32 %v2336_v17, %v3273_v10 }
 0x186   :  { %1726 = vst.msk [vmem:[#allocation2 + $0x78] sm:$0xff] %vm1710_vm1, %v1709_v46 }
 0x187   :  { %1724 = vst.msk [vmem:[#allocation2 + $0x68] sm:$0xff] %vm1710_vm1, %v1707_v44 }
 0x188   :  { %2348 = shalt.err (!%p2345_p4)
}
 0x189   :  { %s2360_s10 = smov 128   ;;  %s2361_s11 = smov 8  }
 0x18a   :  { %1738 = dma.vmem_to_hbm [thread:$0]  %s1733_s9, 2048, %s3314_s3, [#allocation3], %s2360_s10, %s2360_s10, %s2361_s11  }
 0x18b   :  { %2357 = dma.done.wait [#allocation3], 2048  }
 0x18c   :  { %2358 = vsyncadd [#allocation3], 4294965248 }
 0x18d   :  { %1742 = vsyncpa [#allocation3], 1 }

</bundles_post_ra>
